<compile_context>
chip_gen: v6e
topology: v6e:2x2x1
jax: 0.10.0
libtpu: 0.0.40
codegen_flags: <defaults>
</compile_context>

<pallas_src>
import jax
import jax.numpy as jnp
import numpy as np
from jax.experimental import pallas as pl
from jax.experimental.pallas import tpu as pltpu

LANE = 128         # lane width / padding granule for hidden & output feature dims
SUBLANE_BF16 = 16  # bf16 sublane granule -> minimum batch tile
MAX_BLOCK_M = 512  # amortizes per-grid-step overhead; still tiny vs VMEM


def _round_up(n, m):
    return ((n + m - 1) // m) * m


def _default_epilogue_dtype():
    """bf16 bias-add/ReLU on chips with a bf16 VPU (v6e/v7x), f32 otherwise (v5e)."""
    try:
        kind = jax.devices()[0].device_kind.lower()
    except Exception:
        return jnp.float32
    if any(tag in kind for tag in ("v6", "6e", "v7", "7x")):
        return jnp.bfloat16
    return jnp.float32


def _pick_block_m(batch):
    return min(_round_up(max(batch, 1), SUBLANE_BF16), MAX_BLOCK_M)


def catan_dqn_kernel(x_ref,
                     w1_ref, b1_ref,
                     w2_ref, b2_ref,
                     w3_ref, b3_ref,
                     w4_ref, b4_ref,
                     w5_ref, b5_ref,
                     o_ref):
    def layer(h_bf16, w_ref, b_ref, relu):
        # bf16 operands -> MXU with f32 accumulation; epilogue dtype follows the
        # bias dtype (bf16 on v6e/v7x, f32 on v5e which has no bf16 VALU).
        acc = jnp.dot(h_bf16, w_ref[...], preferred_element_type=jnp.float32)
        b = b_ref[...]
        acc = acc.astype(b.dtype) + b
        if relu:
            acc = jnp.maximum(acc, 0).astype(jnp.bfloat16)
        return acc

    h = layer(x_ref[...], w1_ref, b1_ref, relu=True)
    h = layer(h, w2_ref, b2_ref, relu=True)   # dropout p=0.1 -> identity (eval)
    h = layer(h, w3_ref, b3_ref, relu=True)   # dropout -> identity
    h = layer(h, w4_ref, b4_ref, relu=True)   # dropout -> identity
    out = layer(h, w5_ref, b5_ref, relu=False)
    o_ref[...] = out.astype(o_ref.dtype)      # padded output cols are exactly 0
    # TODO(synk): training-mode dropout (p=0.1) would need pltpu.prng_random_bits
    #             + masking/scaling; forward here matches model.eval() semantics.


def prepare_params(params, *, epilogue_dtype=None):
    """Pad + cast the per-layer (w, b) ONCE (hoisted out of the forward path).

    params: list of (w, b); w = [in_features, out_features] f32,
            b = [out_features] or [1, out_features] f32.
    Returns (weights_bf16, biases, n_actions) for catan_dqn_forward.
    """
    if epilogue_dtype is None:
        epilogue_dtype = _default_epilogue_dtype()
    w_pad, b_pad = [], []
    for li, (w, b) in enumerate(params):
        in_dim, out_dim = w.shape
        # Layer-1 contraction dim stays unpadded (block == full extent is legal);
        # hidden / output dims are padded to a 128-lane multiple.
        in_p = in_dim if li == 0 else _round_up(in_dim, LANE)
        out_p = _round_up(out_dim, LANE)
        wp = jnp.zeros((in_p, out_p), jnp.bfloat16)
        wp = wp.at[:in_dim, :out_dim].set(w.astype(jnp.bfloat16))
        bp = jnp.zeros((1, out_p), epilogue_dtype)
        bp = bp.at[:, :out_dim].set(jnp.reshape(b, (1, -1)).astype(epilogue_dtype))
        w_pad.append(wp)
        b_pad.append(bp)
    n_actions = params[-1][0].shape[1]
    return tuple(w_pad), tuple(b_pad), n_actions


def catan_dqn_forward(x, prepared, *, block_m=None, kernel_out_dtype=jnp.float32):
    """x: [B, n_obs] float32. prepared: output of prepare_params()."""
    w_pad, b_pad, n_actions = prepared
    B, n_obs = x.shape
    assert w_pad[0].shape[0] == n_obs, "prepare_params / input feature mismatch"
    out_p = w_pad[-1].shape[1]

    if block_m is None:
        block_m = _pick_block_m(B)
    b_padded = _round_up(max(B, 1), block_m)
    grid = (b_padded // block_m,)

    # Only the batch rows are padded; layer-1 K stays at n_obs (full extent).
    xp = jnp.zeros((b_padded, n_obs), jnp.bfloat16)
    xp = xp.at[:B, :].set(x.astype(jnp.bfloat16))

    x_spec = pl.BlockSpec((block_m, n_obs), lambda i: (i, 0))
    out_spec = pl.BlockSpec((block_m, out_p), lambda i: (i, 0))

    flops = 2 * b_padded * sum(w.shape[0] * w.shape[1] for w in w_pad)
    bytes_accessed = (
        xp.size * 2
        + sum(w.size * 2 for w in w_pad)
        + sum(b.size * b.dtype.itemsize for b in b_pad)
        + b_padded * out_p * np.dtype(kernel_out_dtype).itemsize
    )
    cost = pl.CostEstimate(flops=flops, transcendentals=0,
                           bytes_accessed=bytes_accessed)

    flat_args = [xp]
    for w, b in zip(w_pad, b_pad):
        flat_args.extend([w, b])

    def _run(single_buffer_params):
        # Constant block index -> params stay VMEM-resident across grid steps;
        # Buffered(1) drops the redundant second buffer where supported.
        extra = ({"pipeline_mode": pl.Buffered(1)} if single_buffer_params else {})
        param_specs = []
        for w, b in zip(w_pad, b_pad):
            param_specs.append(pl.BlockSpec(w.shape, lambda i: (0, 0), **extra))
            param_specs.append(pl.BlockSpec(b.shape, lambda i: (0, 0), **extra))
        return pl.pallas_call(
            catan_dqn_kernel,
            out_shape=jax.ShapeDtypeStruct((b_padded, out_p), kernel_out_dtype),
            grid=grid,
            in_specs=[x_spec] + param_specs,
            out_specs=out_spec,
            compiler_params=pltpu.CompilerParams(
                dimension_semantics=("parallel",)),
            cost_estimate=cost,
        )(*flat_args)

    try:
        out_padded = _run(True)
    except Exception:
        # Some Pallas versions may reject single-buffered param BlockSpecs;
        # fall back to default double-buffered params (correctness identical).
        out_padded = _run(False)

    return out_padded[:B, :n_actions].astype(jnp.float32)


def init_linear(key, fan_in, fan_out):
    """Deterministic init mimicking nn.Linear's uniform(-1/sqrt(in), 1/sqrt(in))."""
    kw, kb = jax.random.split(key)
    bound = 1.0 / (fan_in ** 0.5)
    w = jax.random.uniform(kw, (fan_in, fan_out), jnp.float32, -bound, bound)
    b = jax.random.uniform(kb, (1, fan_out), jnp.float32, -bound, bound)
    return w, b


def reference_forward_f32(x, params):
    h = x
    for i, (w, b) in enumerate(params):
        h = h @ w + jnp.reshape(b, (1, -1))
        if i < len(params) - 1:
            h = jnp.maximum(h, 0.0)
    return h


def reference_forward_matched(x, params, epilogue_dtype):
    """Mirrors kernel numerics: bf16 MXU operands, f32 accumulate,
    bias-add/ReLU in `epilogue_dtype` (bf16 on v6e/v7x, f32 on v5e)."""
    h = x.astype(jnp.bfloat16)
    out = None
    for i, (w, b) in enumerate(params):
        acc = jnp.dot(h, w.astype(jnp.bfloat16),
                      preferred_element_type=jnp.float32)
        acc = acc.astype(epilogue_dtype) + jnp.reshape(b, (1, -1)).astype(epilogue_dtype)
        if i < len(params) - 1:
            h = jnp.maximum(acc, 0).astype(jnp.bfloat16)
        else:
            out = acc
    return out.astype(jnp.float32)


if __name__ == "__main__":
    n_observations = 64
    n_actions = 32
    batch = 8

    key = jax.random.PRNGKey(0)
    keys = jax.random.split(key, 6)

    dims = [n_observations, 384, 256, 192, 160, n_actions]
    params = [init_linear(keys[i], dims[i], dims[i + 1]) for i in range(5)]

    x = jax.random.normal(keys[5], (batch, n_observations), jnp.float32)

    # Pad / cast parameters ONCE (hoisted out of the per-call forward path).
    epi_dtype = _default_epilogue_dtype()
    prepared = prepare_params(params, epilogue_dtype=epi_dtype)

    out = catan_dqn_forward(x, prepared)
    out = jax.block_until_ready(out)
    assert out.shape == (batch, n_actions)

    # Tight check vs a reference mirroring the kernel's exact numerics.
    ref_matched = reference_forward_matched(x, params, epi_dtype)
    assert jnp.allclose(out, ref_matched, atol=1e-2, rtol=1e-2), \
        "mismatch vs matched bf16-MXU reference"

    # Loose sanity check vs the full-f32 PyTorch-equivalent forward.
    ref_f32 = reference_forward_f32(x, params)
    assert jnp.allclose(out, ref_f32, atol=1e-1, rtol=1e-1), \
        "mismatch vs f32 reference"

    print("KERNEL_OK")
</pallas_src>

<mosaic_0001>
module attributes {stable_mosaic.version = 11 : i64} {
  func.func @catan_dqn_kernel(%arg0: i32, %arg1: memref<16x64xbf16, #tpu.memory_space<vmem>>, %arg2: memref<64x384xbf16, #tpu.memory_space<vmem>>, %arg3: memref<1x384xf32, #tpu.memory_space<vmem>>, %arg4: memref<384x256xbf16, #tpu.memory_space<vmem>>, %arg5: memref<1x256xf32, #tpu.memory_space<vmem>>, %arg6: memref<256x256xbf16, #tpu.memory_space<vmem>>, %arg7: memref<1x256xf32, #tpu.memory_space<vmem>>, %arg8: memref<256x256xbf16, #tpu.memory_space<vmem>>, %arg9: memref<1x256xf32, #tpu.memory_space<vmem>>, %arg10: memref<256x128xbf16, #tpu.memory_space<vmem>>, %arg11: memref<1x128xf32, #tpu.memory_space<vmem>>, %arg12: memref<16x128xf32, #tpu.memory_space<vmem>>) attributes {dimension_semantics = [#tpu.dimension_semantics<parallel>], iteration_bounds = array<i64: 1>, scalar_prefetch = 0 : i64, scratch_operands = 0 : i64, tpu.core_type = #tpu.core_type<tc>, window_params = [{transform_indices = @transform_0, window_bounds = array<i64: 16, 64>}, {pipeline_mode = #tpu.pipeline_mode<synchronous>, transform_indices = @transform_1, window_bounds = array<i64: 64, 384>}, {pipeline_mode = #tpu.pipeline_mode<synchronous>, transform_indices = @transform_2, window_bounds = array<i64: 1, 384>}, {pipeline_mode = #tpu.pipeline_mode<synchronous>, transform_indices = @transform_3, window_bounds = array<i64: 384, 256>}, {pipeline_mode = #tpu.pipeline_mode<synchronous>, transform_indices = @transform_4, window_bounds = array<i64: 1, 256>}, {pipeline_mode = #tpu.pipeline_mode<synchronous>, transform_indices = @transform_5, window_bounds = array<i64: 256, 256>}, {pipeline_mode = #tpu.pipeline_mode<synchronous>, transform_indices = @transform_6, window_bounds = array<i64: 1, 256>}, {pipeline_mode = #tpu.pipeline_mode<synchronous>, transform_indices = @transform_7, window_bounds = array<i64: 256, 256>}, {pipeline_mode = #tpu.pipeline_mode<synchronous>, transform_indices = @transform_8, window_bounds = array<i64: 1, 256>}, {pipeline_mode = #tpu.pipeline_mode<synchronous>, transform_indices = @transform_9, window_bounds = array<i64: 256, 128>}, {pipeline_mode = #tpu.pipeline_mode<synchronous>, transform_indices = @transform_10, window_bounds = array<i64: 1, 128>}, {transform_indices = @transform_11, window_bounds = array<i64: 16, 128>}]} {
    %c0 = arith.constant 0 : index
    %c0_0 = arith.constant 0 : index
    %0 = vector.load %arg1[%c0, %c0_0] : memref<16x64xbf16, #tpu.memory_space<vmem>>, vector<16x64xbf16>
    %c0_1 = arith.constant 0 : index
    %c0_2 = arith.constant 0 : index
    %1 = vector.load %arg2[%c0_1, %c0_2] : memref<64x384xbf16, #tpu.memory_space<vmem>>, vector<64x384xbf16>
    %cst = arith.constant dense<0.000000e+00> : vector<16x384xf32>
    %2 = tpu.matmul %0, %1, %cst {dimension_numbers = #tpu.dot_dimension_numbers<[1], [0], [0], [1], [0, 0, 1, 1], [], []>} : vector<16x64xbf16>, vector<64x384xbf16>, vector<16x384xf32> -> vector<16x384xf32>
    %c0_3 = arith.constant 0 : index
    %c0_4 = arith.constant 0 : index
    %3 = vector.load %arg3[%c0_3, %c0_4] : memref<1x384xf32, #tpu.memory_space<vmem>>, vector<1x384xf32>
    %4 = vector.broadcast %3 : vector<1x384xf32> to vector<16x384xf32>
    %5 = arith.addf %2, %4 : vector<16x384xf32>
    %cst_5 = arith.constant 0.000000e+00 : f32
    %6 = vector.broadcast %cst_5 : f32 to vector<16x384xf32>
    %7 = arith.maximumf %5, %6 : vector<16x384xf32>
    %8 = arith.truncf %7 : vector<16x384xf32> to vector<16x384xbf16>
    %c0_6 = arith.constant 0 : index
    %c0_7 = arith.constant 0 : index
    %9 = vector.load %arg4[%c0_6, %c0_7] : memref<384x256xbf16, #tpu.memory_space<vmem>>, vector<384x256xbf16>
    %cst_8 = arith.constant dense<0.000000e+00> : vector<16x256xf32>
    %10 = tpu.matmul %8, %9, %cst_8 {dimension_numbers = #tpu.dot_dimension_numbers<[1], [0], [0], [1], [0, 0, 1, 1], [], []>} : vector<16x384xbf16>, vector<384x256xbf16>, vector<16x256xf32> -> vector<16x256xf32>
    %c0_9 = arith.constant 0 : index
    %c0_10 = arith.constant 0 : index
    %11 = vector.load %arg5[%c0_9, %c0_10] : memref<1x256xf32, #tpu.memory_space<vmem>>, vector<1x256xf32>
    %12 = vector.broadcast %11 : vector<1x256xf32> to vector<16x256xf32>
    %13 = arith.addf %10, %12 : vector<16x256xf32>
    %cst_11 = arith.constant 0.000000e+00 : f32
    %14 = vector.broadcast %cst_11 : f32 to vector<16x256xf32>
    %15 = arith.maximumf %13, %14 : vector<16x256xf32>
    %16 = arith.truncf %15 : vector<16x256xf32> to vector<16x256xbf16>
    %c0_12 = arith.constant 0 : index
    %c0_13 = arith.constant 0 : index
    %17 = vector.load %arg6[%c0_12, %c0_13] : memref<256x256xbf16, #tpu.memory_space<vmem>>, vector<256x256xbf16>
    %cst_14 = arith.constant dense<0.000000e+00> : vector<16x256xf32>
    %18 = tpu.matmul %16, %17, %cst_14 {dimension_numbers = #tpu.dot_dimension_numbers<[1], [0], [0], [1], [0, 0, 1, 1], [], []>} : vector<16x256xbf16>, vector<256x256xbf16>, vector<16x256xf32> -> vector<16x256xf32>
    %c0_15 = arith.constant 0 : index
    %c0_16 = arith.constant 0 : index
    %19 = vector.load %arg7[%c0_15, %c0_16] : memref<1x256xf32, #tpu.memory_space<vmem>>, vector<1x256xf32>
    %20 = vector.broadcast %19 : vector<1x256xf32> to vector<16x256xf32>
    %21 = arith.addf %18, %20 : vector<16x256xf32>
    %cst_17 = arith.constant 0.000000e+00 : f32
    %22 = vector.broadcast %cst_17 : f32 to vector<16x256xf32>
    %23 = arith.maximumf %21, %22 : vector<16x256xf32>
    %24 = arith.truncf %23 : vector<16x256xf32> to vector<16x256xbf16>
    %c0_18 = arith.constant 0 : index
    %c0_19 = arith.constant 0 : index
    %25 = vector.load %arg8[%c0_18, %c0_19] : memref<256x256xbf16, #tpu.memory_space<vmem>>, vector<256x256xbf16>
    %cst_20 = arith.constant dense<0.000000e+00> : vector<16x256xf32>
    %26 = tpu.matmul %24, %25, %cst_20 {dimension_numbers = #tpu.dot_dimension_numbers<[1], [0], [0], [1], [0, 0, 1, 1], [], []>} : vector<16x256xbf16>, vector<256x256xbf16>, vector<16x256xf32> -> vector<16x256xf32>
    %c0_21 = arith.constant 0 : index
    %c0_22 = arith.constant 0 : index
    %27 = vector.load %arg9[%c0_21, %c0_22] : memref<1x256xf32, #tpu.memory_space<vmem>>, vector<1x256xf32>
    %28 = vector.broadcast %27 : vector<1x256xf32> to vector<16x256xf32>
    %29 = arith.addf %26, %28 : vector<16x256xf32>
    %cst_23 = arith.constant 0.000000e+00 : f32
    %30 = vector.broadcast %cst_23 : f32 to vector<16x256xf32>
    %31 = arith.maximumf %29, %30 : vector<16x256xf32>
    %32 = arith.truncf %31 : vector<16x256xf32> to vector<16x256xbf16>
    %c0_24 = arith.constant 0 : index
    %c0_25 = arith.constant 0 : index
    %33 = vector.load %arg10[%c0_24, %c0_25] : memref<256x128xbf16, #tpu.memory_space<vmem>>, vector<256x128xbf16>
    %cst_26 = arith.constant dense<0.000000e+00> : vector<16x128xf32>
    %34 = tpu.matmul %32, %33, %cst_26 {dimension_numbers = #tpu.dot_dimension_numbers<[1], [0], [0], [1], [0, 0, 1, 1], [], []>} : vector<16x256xbf16>, vector<256x128xbf16>, vector<16x128xf32> -> vector<16x128xf32>
    %c0_27 = arith.constant 0 : index
    %c0_28 = arith.constant 0 : index
    %35 = vector.load %arg11[%c0_27, %c0_28] : memref<1x128xf32, #tpu.memory_space<vmem>>, vector<1x128xf32>
    %36 = vector.broadcast %35 : vector<1x128xf32> to vector<16x128xf32>
    %37 = arith.addf %34, %36 : vector<16x128xf32>
    %c0_29 = arith.constant 0 : index
    %c0_30 = arith.constant 0 : index
    %38 = vector.load %arg12[%c0_29, %c0_30] : memref<16x128xf32, #tpu.memory_space<vmem>>, vector<16x128xf32>
    tpu.vector_store %arg12[%c0_29, %c0_30], %37 {strides = array<i32>} : memref<16x128xf32, #tpu.memory_space<vmem>>, vector<16x128xf32>,
    return
  }
  func.func @transform_0(%arg0: i32) -> (i32, i32) {
    %c0_i32 = arith.constant 0 : i32
    %c0_i32_0 = arith.constant 0 : i32
    return %arg0, %c0_i32 : i32, i32
  }
  func.func @transform_1(%arg0: i32) -> (i32, i32) {
    %c0_i32 = arith.constant 0 : i32
    %c0_i32_0 = arith.constant 0 : i32
    %c0_i32_1 = arith.constant 0 : i32
    return %c0_i32, %c0_i32_0 : i32, i32
  }
  func.func @transform_2(%arg0: i32) -> (i32, i32) {
    %c0_i32 = arith.constant 0 : i32
    %c0_i32_0 = arith.constant 0 : i32
    %c0_i32_1 = arith.constant 0 : i32
    return %c0_i32, %c0_i32_0 : i32, i32
  }
  func.func @transform_3(%arg0: i32) -> (i32, i32) {
    %c0_i32 = arith.constant 0 : i32
    %c0_i32_0 = arith.constant 0 : i32
    %c0_i32_1 = arith.constant 0 : i32
    return %c0_i32, %c0_i32_0 : i32, i32
  }
  func.func @transform_4(%arg0: i32) -> (i32, i32) {
    %c0_i32 = arith.constant 0 : i32
    %c0_i32_0 = arith.constant 0 : i32
    %c0_i32_1 = arith.constant 0 : i32
    return %c0_i32, %c0_i32_0 : i32, i32
  }
  func.func @transform_5(%arg0: i32) -> (i32, i32) {
    %c0_i32 = arith.constant 0 : i32
    %c0_i32_0 = arith.constant 0 : i32
    %c0_i32_1 = arith.constant 0 : i32
    return %c0_i32, %c0_i32_0 : i32, i32
  }
  func.func @transform_6(%arg0: i32) -> (i32, i32) {
    %c0_i32 = arith.constant 0 : i32
    %c0_i32_0 = arith.constant 0 : i32
    %c0_i32_1 = arith.constant 0 : i32
    return %c0_i32, %c0_i32_0 : i32, i32
  }
  func.func @transform_7(%arg0: i32) -> (i32, i32) {
    %c0_i32 = arith.constant 0 : i32
    %c0_i32_0 = arith.constant 0 : i32
    %c0_i32_1 = arith.constant 0 : i32
    return %c0_i32, %c0_i32_0 : i32, i32
  }
  func.func @transform_8(%arg0: i32) -> (i32, i32) {
    %c0_i32 = arith.constant 0 : i32
    %c0_i32_0 = arith.constant 0 : i32
    %c0_i32_1 = arith.constant 0 : i32
    return %c0_i32, %c0_i32_0 : i32, i32
  }
  func.func @transform_9(%arg0: i32) -> (i32, i32) {
    %c0_i32 = arith.constant 0 : i32
    %c0_i32_0 = arith.constant 0 : i32
    %c0_i32_1 = arith.constant 0 : i32
    return %c0_i32, %c0_i32_0 : i32, i32
  }
  func.func @transform_10(%arg0: i32) -> (i32, i32) {
    %c0_i32 = arith.constant 0 : i32
    %c0_i32_0 = arith.constant 0 : i32
    %c0_i32_1 = arith.constant 0 : i32
    return %c0_i32, %c0_i32_0 : i32, i32
  }
  func.func @transform_11(%arg0: i32) -> (i32, i32) {
    %c0_i32 = arith.constant 0 : i32
    %c0_i32_0 = arith.constant 0 : i32
    return %arg0, %c0_i32 : i32, i32
  }
}

module attributes {stable_mosaic.version = 11 : i64} {
  func.func @catan_dqn_kernel(%arg0: i32, %arg1: memref<16x64xbf16, #tpu.memory_space<vmem>>, %arg2: memref<64x384xbf16, #tpu.memory_space<vmem>>, %arg3: memref<1x384xf32, #tpu.memory_space<vmem>>, %arg4: memref<384x256xbf16, #tpu.memory_space<vmem>>, %arg5: memref<1x256xf32, #tpu.memory_space<vmem>>, %arg6: memref<256x256xbf16, #tpu.memory_space<vmem>>, %arg7: memref<1x256xf32, #tpu.memory_space<vmem>>, %arg8: memref<256x256xbf16, #tpu.memory_space<vmem>>, %arg9: memref<1x256xf32, #tpu.memory_space<vmem>>, %arg10: memref<256x128xbf16, #tpu.memory_space<vmem>>, %arg11: memref<1x128xf32, #tpu.memory_space<vmem>>, %arg12: memref<16x128xf32, #tpu.memory_space<vmem>>) attributes {dimension_semantics = [#tpu.dimension_semantics<parallel>], iteration_bounds = array<i64: 1>, scalar_prefetch = 0 : i64, scratch_operands = 0 : i64, tpu.core_type = #tpu.core_type<tc>, window_params = [{transform_indices = @transform_0, window_bounds = array<i64: 16, 64>}, {pipeline_mode = #tpu.pipeline_mode<synchronous>, transform_indices = @transform_1, window_bounds = array<i64: 64, 384>}, {pipeline_mode = #tpu.pipeline_mode<synchronous>, transform_indices = @transform_2, window_bounds = array<i64: 1, 384>}, {pipeline_mode = #tpu.pipeline_mode<synchronous>, transform_indices = @transform_3, window_bounds = array<i64: 384, 256>}, {pipeline_mode = #tpu.pipeline_mode<synchronous>, transform_indices = @transform_4, window_bounds = array<i64: 1, 256>}, {pipeline_mode = #tpu.pipeline_mode<synchronous>, transform_indices = @transform_5, window_bounds = array<i64: 256, 256>}, {pipeline_mode = #tpu.pipeline_mode<synchronous>, transform_indices = @transform_6, window_bounds = array<i64: 1, 256>}, {pipeline_mode = #tpu.pipeline_mode<synchronous>, transform_indices = @transform_7, window_bounds = array<i64: 256, 256>}, {pipeline_mode = #tpu.pipeline_mode<synchronous>, transform_indices = @transform_8, window_bounds = array<i64: 1, 256>}, {pipeline_mode = #tpu.pipeline_mode<synchronous>, transform_indices = @transform_9, window_bounds = array<i64: 256, 128>}, {pipeline_mode = #tpu.pipeline_mode<synchronous>, transform_indices = @transform_10, window_bounds = array<i64: 1, 128>}, {transform_indices = @transform_11, window_bounds = array<i64: 16, 128>}]} {
    %c0 = arith.constant 0 : index
    %c0_0 = arith.constant 0 : index
    %0 = vector.load %arg1[%c0, %c0_0] : memref<16x64xbf16, #tpu.memory_space<vmem>>, vector<16x64xbf16>
    %c0_1 = arith.constant 0 : index
    %c0_2 = arith.constant 0 : index
    %1 = vector.load %arg2[%c0_1, %c0_2] : memref<64x384xbf16, #tpu.memory_space<vmem>>, vector<64x384xbf16>
    %cst = arith.constant dense<0.000000e+00> : vector<16x384xf32>
    %2 = tpu.matmul %0, %1, %cst {dimension_numbers = #tpu.dot_dimension_numbers<[1], [0], [0], [1], [0, 0, 1, 1], [], []>} : vector<16x64xbf16>, vector<64x384xbf16>, vector<16x384xf32> -> vector<16x384xf32>
    %c0_3 = arith.constant 0 : index
    %c0_4 = arith.constant 0 : index
    %3 = vector.load %arg3[%c0_3, %c0_4] : memref<1x384xf32, #tpu.memory_space<vmem>>, vector<1x384xf32>
    %4 = vector.broadcast %3 : vector<1x384xf32> to vector<16x384xf32>
    %5 = arith.addf %2, %4 : vector<16x384xf32>
    %cst_5 = arith.constant 0.000000e+00 : f32
    %6 = vector.broadcast %cst_5 : f32 to vector<16x384xf32>
    %7 = arith.maximumf %5, %6 : vector<16x384xf32>
    %8 = arith.truncf %7 : vector<16x384xf32> to vector<16x384xbf16>
    %c0_6 = arith.constant 0 : index
    %c0_7 = arith.constant 0 : index
    %9 = vector.load %arg4[%c0_6, %c0_7] : memref<384x256xbf16, #tpu.memory_space<vmem>>, vector<384x256xbf16>
    %cst_8 = arith.constant dense<0.000000e+00> : vector<16x256xf32>
    %10 = tpu.matmul %8, %9, %cst_8 {dimension_numbers = #tpu.dot_dimension_numbers<[1], [0], [0], [1], [0, 0, 1, 1], [], []>} : vector<16x384xbf16>, vector<384x256xbf16>, vector<16x256xf32> -> vector<16x256xf32>
    %c0_9 = arith.constant 0 : index
    %c0_10 = arith.constant 0 : index
    %11 = vector.load %arg5[%c0_9, %c0_10] : memref<1x256xf32, #tpu.memory_space<vmem>>, vector<1x256xf32>
    %12 = vector.broadcast %11 : vector<1x256xf32> to vector<16x256xf32>
    %13 = arith.addf %10, %12 : vector<16x256xf32>
    %cst_11 = arith.constant 0.000000e+00 : f32
    %14 = vector.broadcast %cst_11 : f32 to vector<16x256xf32>
    %15 = arith.maximumf %13, %14 : vector<16x256xf32>
    %16 = arith.truncf %15 : vector<16x256xf32> to vector<16x256xbf16>
    %c0_12 = arith.constant 0 : index
    %c0_13 = arith.constant 0 : index
    %17 = vector.load %arg6[%c0_12, %c0_13] : memref<256x256xbf16, #tpu.memory_space<vmem>>, vector<256x256xbf16>
    %cst_14 = arith.constant dense<0.000000e+00> : vector<16x256xf32>
    %18 = tpu.matmul %16, %17, %cst_14 {dimension_numbers = #tpu.dot_dimension_numbers<[1], [0], [0], [1], [0, 0, 1, 1], [], []>} : vector<16x256xbf16>, vector<256x256xbf16>, vector<16x256xf32> -> vector<16x256xf32>
    %c0_15 = arith.constant 0 : index
    %c0_16 = arith.constant 0 : index
    %19 = vector.load %arg7[%c0_15, %c0_16] : memref<1x256xf32, #tpu.memory_space<vmem>>, vector<1x256xf32>
    %20 = vector.broadcast %19 : vector<1x256xf32> to vector<16x256xf32>
    %21 = arith.addf %18, %20 : vector<16x256xf32>
    %cst_17 = arith.constant 0.000000e+00 : f32
    %22 = vector.broadcast %cst_17 : f32 to vector<16x256xf32>
    %23 = arith.maximumf %21, %22 : vector<16x256xf32>
    %24 = arith.truncf %23 : vector<16x256xf32> to vector<16x256xbf16>
    %c0_18 = arith.constant 0 : index
    %c0_19 = arith.constant 0 : index
    %25 = vector.load %arg8[%c0_18, %c0_19] : memref<256x256xbf16, #tpu.memory_space<vmem>>, vector<256x256xbf16>
    %cst_20 = arith.constant dense<0.000000e+00> : vector<16x256xf32>
    %26 = tpu.matmul %24, %25, %cst_20 {dimension_numbers = #tpu.dot_dimension_numbers<[1], [0], [0], [1], [0, 0, 1, 1], [], []>} : vector<16x256xbf16>, vector<256x256xbf16>, vector<16x256xf32> -> vector<16x256xf32>
    %c0_21 = arith.constant 0 : index
    %c0_22 = arith.constant 0 : index
    %27 = vector.load %arg9[%c0_21, %c0_22] : memref<1x256xf32, #tpu.memory_space<vmem>>, vector<1x256xf32>
    %28 = vector.broadcast %27 : vector<1x256xf32> to vector<16x256xf32>
    %29 = arith.addf %26, %28 : vector<16x256xf32>
    %cst_23 = arith.constant 0.000000e+00 : f32
    %30 = vector.broadcast %cst_23 : f32 to vector<16x256xf32>
    %31 = arith.maximumf %29, %30 : vector<16x256xf32>
    %32 = arith.truncf %31 : vector<16x256xf32> to vector<16x256xbf16>
    %c0_24 = arith.constant 0 : index
    %c0_25 = arith.constant 0 : index
    %33 = vector.load %arg10[%c0_24, %c0_25] : memref<256x128xbf16, #tpu.memory_space<vmem>>, vector<256x128xbf16>
    %cst_26 = arith.constant dense<0.000000e+00> : vector<16x128xf32>
    %34 = tpu.matmul %32, %33, %cst_26 {dimension_numbers = #tpu.dot_dimension_numbers<[1], [0], [0], [1], [0, 0, 1, 1], [], []>} : vector<16x256xbf16>, vector<256x128xbf16>, vector<16x128xf32> -> vector<16x128xf32>
    %c0_27 = arith.constant 0 : index
    %c0_28 = arith.constant 0 : index
    %35 = vector.load %arg11[%c0_27, %c0_28] : memref<1x128xf32, #tpu.memory_space<vmem>>, vector<1x128xf32>
    %36 = vector.broadcast %35 : vector<1x128xf32> to vector<16x128xf32>
    %37 = arith.addf %34, %36 : vector<16x128xf32>
    %c0_29 = arith.constant 0 : index
    %c0_30 = arith.constant 0 : index
    %38 = vector.load %arg12[%c0_29, %c0_30] : memref<16x128xf32, #tpu.memory_space<vmem>>, vector<16x128xf32>
    tpu.vector_store %arg12[%c0_29, %c0_30], %37 {strides = array<i32>} : memref<16x128xf32, #tpu.memory_space<vmem>>, vector<16x128xf32>,
    return
  }
  func.func @transform_0(%arg0: i32) -> (i32, i32) {
    %c0_i32 = arith.constant 0 : i32
    %c0_i32_0 = arith.constant 0 : i32
    return %arg0, %c0_i32 : i32, i32
  }
  func.func @transform_1(%arg0: i32) -> (i32, i32) {
    %c0_i32 = arith.constant 0 : i32
    %c0_i32_0 = arith.constant 0 : i32
    %c0_i32_1 = arith.constant 0 : i32
    return %c0_i32, %c0_i32_0 : i32, i32
  }
  func.func @transform_2(%arg0: i32) -> (i32, i32) {
    %c0_i32 = arith.constant 0 : i32
    %c0_i32_0 = arith.constant 0 : i32
    %c0_i32_1 = arith.constant 0 : i32
    return %c0_i32, %c0_i32_0 : i32, i32
  }
  func.func @transform_3(%arg0: i32) -> (i32, i32) {
    %c0_i32 = arith.constant 0 : i32
    %c0_i32_0 = arith.constant 0 : i32
    %c0_i32_1 = arith.constant 0 : i32
    return %c0_i32, %c0_i32_0 : i32, i32
  }
  func.func @transform_4(%arg0: i32) -> (i32, i32) {
    %c0_i32 = arith.constant 0 : i32
    %c0_i32_0 = arith.constant 0 : i32
    %c0_i32_1 = arith.constant 0 : i32
    return %c0_i32, %c0_i32_0 : i32, i32
  }
  func.func @transform_5(%arg0: i32) -> (i32, i32) {
    %c0_i32 = arith.constant 0 : i32
    %c0_i32_0 = arith.constant 0 : i32
    %c0_i32_1 = arith.constant 0 : i32
    return %c0_i32, %c0_i32_0 : i32, i32
  }
  func.func @transform_6(%arg0: i32) -> (i32, i32) {
    %c0_i32 = arith.constant 0 : i32
    %c0_i32_0 = arith.constant 0 : i32
    %c0_i32_1 = arith.constant 0 : i32
    return %c0_i32, %c0_i32_0 : i32, i32
  }
  func.func @transform_7(%arg0: i32) -> (i32, i32) {
    %c0_i32 = arith.constant 0 : i32
    %c0_i32_0 = arith.constant 0 : i32
    %c0_i32_1 = arith.constant 0 : i32
    return %c0_i32, %c0_i32_0 : i32, i32
  }
  func.func @transform_8(%arg0: i32) -> (i32, i32) {
    %c0_i32 = arith.constant 0 : i32
    %c0_i32_0 = arith.constant 0 : i32
    %c0_i32_1 = arith.constant 0 : i32
    return %c0_i32, %c0_i32_0 : i32, i32
  }
  func.func @transform_9(%arg0: i32) -> (i32, i32) {
    %c0_i32 = arith.constant 0 : i32
    %c0_i32_0 = arith.constant 0 : i32
    %c0_i32_1 = arith.constant 0 : i32
    return %c0_i32, %c0_i32_0 : i32, i32
  }
  func.func @transform_10(%arg0: i32) -> (i32, i32) {
    %c0_i32 = arith.constant 0 : i32
    %c0_i32_0 = arith.constant 0 : i32
    %c0_i32_1 = arith.constant 0 : i32
    return %c0_i32, %c0_i32_0 : i32, i32
  }
  func.func @transform_11(%arg0: i32) -> (i32, i32) {
    %c0_i32 = arith.constant 0 : i32
    %c0_i32_0 = arith.constant 0 : i32
    return %arg0, %c0_i32 : i32, i32
  }
}

</mosaic_0001>

<bundles_post_ra>
// kernel: tpu_custom_call.1
= control target key start
LH: loop header
LB: loop body
LE: loop exit
PB: predicated region body
PF: predicated region fallthrough
CT: control target
= control target key end

     0   :  { %16 = vsyncpa [#allocation3], 0  ;;  %s2111_s0 = inlined_call_operand.hbm [shape: bf16[16,64], index: 0, kind: input, shape index: {}]   ;;  %s2112_s1 = inlined_call_operand.hbm [shape: bf16[64,384], index: 1, kind: input, shape index: {}]   ;;  %s2113_s2 = inlined_call_operand.vmem [shape: f32[1,384], index: 2, kind: input, shape index: {}]   ;;  %s2114_s3 = inlined_call_operand.hbm [shape: bf16[384,256], index: 3, kind: input, shape index: {}]   ;;  %s2115_s4 = inlined_call_operand.vmem [shape: f32[1,256], index: 4, kind: input, shape index: {}]   ;;  %s2116_s5 = inlined_call_operand.hbm [shape: bf16[256,256], index: 5, kind: input, shape index: {}]   ;;  %s2117_s6 = inlined_call_operand.vmem [shape: f32[1,256], index: 6, kind: input, shape index: {}]   ;;  %s2118_s7 = inlined_call_operand.hbm [shape: bf16[256,256], index: 7, kind: input, shape index: {}]   ;;  %s2119_s8 = inlined_call_operand.vmem [shape: f32[1,256], index: 8, kind: input, shape index: {}]   ;;  %s2120_s9 = inlined_call_operand.hbm [shape: bf16[256,128], index: 9, kind: input, shape index: {}]   ;;  %s2121_s10 = inlined_call_operand.vmem [shape: f32[1,128], index: 10, kind: input, shape index: {}]   ;;  %s2122_s11 = inlined_call_operand.hbm [shape: f32[16,128], index: 11, kind: output, shape index: {}]  }
   0x1   :  { %17 = vsyncpa [#allocation6], 0 }
   0x2   :  { %18 = vsyncpa [#allocation9], 0 }
   0x3   :  { %19 = vsyncpa [#allocation12], 0 }
   0x4   :  { %20 = vsyncpa [#allocation4], 0  ;;  %s1969_s17 = smov [#allocation5]  }
   0x5   :  { %s38_s18 = sshll.u32 %s1969_s17, 4  ;;  %s39_s18 = int_to_ptr.vmem [resolvable:$true] %s38_s18 }
   0x6   :  { %s1827_s19 = scalar_lea.vmem %s39_s18, 1536  ;;  %p1832_p1 = scmp.lt.s32.totalorder %s39_s18, %s39_s18 }
   0x7   :  { %p1828_p0 = scmp.ne.s32.totalorder %s39_s18, %s1827_s19  ;;  %p1833_p2 = scmp.lt.s32.totalorder %s1827_s19, %s1827_s19 }
   0x9   :  { %p1834_p3 = por %p1833_p2, %p1832_p1 }
   0xb   :  { %p1835_p4 = pnand %p1834_p3, %p1828_p0 }
   0xd   :  { %1838 = shalt.err (!%p1835_p4)
}
   0xe   :  { %s1970_s20 = smov 192   ;;  %s1971_s21 = smov 12  }
   0xf   :  { %44 = dma.hbm_to_vmem [thread:$0]  %s2112_s1, 1536, %s39_s18, [#allocation6], %s1970_s20, %s1970_s20, %s1971_s21  }
  0x10   :  { %s1972_s24 = smov [#allocation8]   ;;  %s1973_s26 = smov [#allocation2]  }
  0x11   :  { %s66_s25 = sshll.u32 %s1972_s24, 4  ;;  %s26_s27 = sshll.u32 %s1973_s26, 4  ;;  %s67_s25 = int_to_ptr.vmem [resolvable:$true] %s66_s25  ;;  %s27_s27 = int_to_ptr.vmem [resolvable:$true] %s26_s27 }
  0x12   :  { %s1847_s28 = scalar_lea.vmem %s67_s25, 4096  ;;  %p1852_p6 = scmp.lt.s32.totalorder %s67_s25, %s67_s25 }
  0x13   :  { %p1848_p5 = scmp.ne.s32.totalorder %s67_s25, %s1847_s28  ;;  %p1853_p7 = scmp.lt.s32.totalorder %s1847_s28, %s1847_s28 }
  0x15   :  { %p1854_p8 = por %p1853_p7, %p1852_p6 }
  0x17   :  { %p1855_p9 = pnand %p1854_p8, %p1848_p5 }
  0x19   :  { %1858 = shalt.err (!%p1855_p9)
}
  0x1a   :  { %s1974_s29 = smov 128   ;;  %s1975_s30 = smov 8  }
  0x1b   :  { %72 = dma.hbm_to_vmem [thread:$0]  %s2116_s5, 4096, %s67_s25, [#allocation9], %s1974_s29, %s1974_s29, %s1975_s30  }
  0x1c   :  { %s1867_s1 = scalar_lea.vmem %s27_s27, 128  ;;  %p1872_p11 = scmp.lt.s32.totalorder %s27_s27, %s27_s27 }
  0x1d   :  { %p1868_p10 = scmp.ne.s32.totalorder %s27_s27, %s1867_s1  ;;  %p1873_p12 = scmp.lt.s32.totalorder %s1867_s1, %s1867_s1 }
  0x1f   :  { %p1874_p13 = por %p1873_p12, %p1872_p11 }
  0x21   :  { %p1875_p0 = pnand %p1874_p13, %p1868_p10 }
  0x23   :  { %1878 = shalt.err (!%p1875_p0)
}
  0x24   :  { %s1976_s14 = smov 64   ;;  %s1977_s15 = smov 4  }
  0x25   :  { %32 = dma.hbm_to_vmem [thread:$0]  %s2111_s0, 128, %s27_s27, [#allocation3], %s1976_s14, %s1976_s14, %s1977_s15  }
  0x26   :  { %s1978_s18 = smov [#allocation7]   ;;  %s1979_s5 = smov [#allocation10]  }
  0x27   :  { %s52_s19 = sshll.u32 %s1978_s18, 4  ;;  %s80_s20 = sshll.u32 %s1979_s5, 4  ;;  %s53_s19 = int_to_ptr.vmem [resolvable:$true] %s52_s19  ;;  %s81_s20 = int_to_ptr.vmem [resolvable:$true] %s80_s20 }
  0x28   :  { %s1887_s21 = scalar_lea.vmem %s53_s19, 6144  ;;  %p1892_p2 = scmp.lt.s32.totalorder %s53_s19, %s53_s19 }
  0x29   :  { %p1888_p1 = scmp.ne.s32.totalorder %s53_s19, %s1887_s21  ;;  %p1893_p3 = scmp.lt.s32.totalorder %s1887_s21, %s1887_s21 }
  0x2b   :  { %p1894_p4 = por %p1893_p3, %p1892_p2 }
  0x2d   :  { %p1895_p5 = pnand %p1894_p4, %p1888_p1 }
  0x2f   :  { %1898 = shalt.err (!%p1895_p5)
}
  0x30   :  { %58 = dma.hbm_to_vmem [thread:$0]  %s2114_s3, 6144, %s53_s19, [#allocation6], %s1974_s29, %s1974_s29, %s1975_s30  }
  0x31   :  { %s1907_s0 = scalar_lea.vmem %s81_s20, 4096  ;;  %p1912_p7 = scmp.lt.s32.totalorder %s81_s20, %s81_s20 }
  0x32   :  { %p1908_p6 = scmp.ne.s32.totalorder %s81_s20, %s1907_s0  ;;  %p1913_p8 = scmp.lt.s32.totalorder %s1907_s0, %s1907_s0 }
  0x34   :  { %p1914_p9 = por %p1913_p8, %p1912_p7 }
  0x36   :  { %p1915_p10 = pnand %p1914_p9, %p1908_p6 }
  0x38   :  { %1918 = shalt.err (!%p1915_p10)
}
  0x39   :  { %86 = dma.hbm_to_vmem [thread:$0]  %s2118_s7, 4096, %s81_s20, [#allocation9], %s1974_s29, %s1974_s29, %s1975_s30  }
  0x3a   :  { %s1980_s26 = smov [#allocation11]  }
  0x3b   :  { %s94_s27 = sshll.u32 %s1980_s26, 4  ;;  %s95_s27 = int_to_ptr.vmem [resolvable:$true] %s94_s27 }
  0x3c   :  { %s1927_s28 = scalar_lea.vmem %s95_s27, 2048  ;;  %p1932_p12 = scmp.lt.s32.totalorder %s95_s27, %s95_s27 }
  0x3d   :  { %p1928_p11 = scmp.ne.s32.totalorder %s95_s27, %s1927_s28  ;;  %p1933_p13 = scmp.lt.s32.totalorder %s1927_s28, %s1927_s28 }
  0x3f   :  { %p1934_p0 = por %p1933_p13, %p1932_p12 }
  0x41   :  { %p1935_p1 = pnand %p1934_p0, %p1928_p11 }
  0x43   :  { %1938 = shalt.err (!%p1935_p1)
}
  0x44   :  { %100 = dma.hbm_to_vmem [thread:$0]  %s2120_s9, 2048, %s95_s27, [#allocation12], %s1976_s14, %s1976_s14, %s1977_s15  }
  0x45   :  { %1959 = dma.done.wait [#allocation3], 128  }
  0x46   :  { %1960 = vsyncadd [#allocation3], 4294967168 }
  0x47   :  { %1961 = dma.done.wait [#allocation6], 7680  }
  0x48   :  { %1962 = vsyncadd [#allocation6], 4294959616 }
  0x49   :  { %1963 = dma.done.wait [#allocation9], 8192  }
  0x4a   :  { %1964 = vsyncadd [#allocation9], 4294959104 }
  0x4b   :  { %1965 = dma.done.wait [#allocation12], 2048  }
  0x4c   :  { %1966 = vsyncadd [#allocation12], 4294965248  ;;  %v1981_v0 = vmov 0.0   ;;  %vm1982_vm0 = vmmov 0   ;;  %v1983_v1 = vmov 0   ;;  %v1634_v15 = vld [vmem:[#allocation2] sm:$0xff]  }
  0x4d   :  { %1590 = vmatprep.subr.bf16.mxu1 %v1981_v0  ;;  %1598 = vmatprep.mubr.msk.bf16.mxu1 %vm1982_vm0, %v1981_v0  ;;  %v1618_v2 = vld [vmem:[#allocation5 + $0x4c] ss:$12 sps:$4 sm:$0xff]   ;;  %v1620_v3 = vld [vmem:[#allocation5 + $0x50] ss:$12 sps:$4 sm:$0xff]   ;;  %v1621_v4 = vld [vmem:[#allocation5 + $0x48] ss:$12 sps:$4 sm:$0xff]  }
  0x4e   :  { %262 = vmatprep.mubr.bf16.mxu0 %v1983_v1  ;;  %238 = vmatprep.subr.bf16.mxu0 %v1618_v2  ;;  %v1622_v5 = vld [vmem:[#allocation5 + $0x34] ss:$12 sps:$4 sm:$0xff]   ;;  %v1624_v6 = vld [vmem:[#allocation5 + $0x38] ss:$12 sps:$4 sm:$0xff]   ;;  %v1625_v7 = vld [vmem:[#allocation5 + $0x30] ss:$12 sps:$4 sm:$0xff]  }
  0x4f   :  { %1591 = vmatpush3.bf16.msra.mxu1 %v1620_v3  ;;  %239 = vmatpush1.bf16.msra.mxu0 %v1621_v4  ;;  %v1626_v8 = vld [vmem:[#allocation5 + $0x1c] ss:$12 sps:$4 sm:$0xff]   ;;  %v1628_v9 = vld [vmem:[#allocation5 + $0x20] ss:$12 sps:$4 sm:$0xff]   ;;  %v1629_v10 = vld [vmem:[#allocation5 + $0x18] ss:$12 sps:$4 sm:$0xff]  }
  0x50   :  { %1592 = vmatprep.subr.bf16.mxu1 %v1981_v0  ;;  %240 = vmatprep.subr.bf16.mxu0 %v1622_v5  ;;  %v1630_v11 = vld [vmem:[#allocation5 + $0x4] ss:$12 sps:$4 sm:$0xff]   ;;  %v1632_v12 = vld [vmem:[#allocation5 + $0x8] ss:$12 sps:$4 sm:$0xff]   ;;  %v1633_v13 = vld [vmem:[#allocation5] ss:$12 sps:$4 sm:$0xff]  }
  0x51   :  { %v1637_v14 = vld [vmem:[#allocation7 + $0x74] ss:$8 sps:$4 sm:$0xff]   ;;  %vm226_vm1 = vcmask 523264   ;;  %v1635_v16 = vld [vmem:[#allocation7 + $0x70] ss:$8 sps:$4 sm:$0xff]   ;;  %s1984_s16 = smov [#allocation13]  }
  0x52   :  { %v1640_v17 = vld [vmem:[#allocation7 + $0x64] ss:$8 sps:$4 sm:$0xff]   ;;  %v1638_v18 = vld [vmem:[#allocation7 + $0x60] ss:$8 sps:$4 sm:$0xff]   ;;  %v1643_v19 = vld [vmem:[#allocation7 + $0x54] ss:$8 sps:$4 sm:$0xff]  }
  0x53   :  { %1593 = vmatpush3.bf16.msra.mxu1 %v1624_v6  ;;  %241 = vmatpush1.bf16.msra.mxu0 %v1625_v7  ;;  %v1659_v20 = vld [vmem:[#allocation7 + $0x170] ss:$8 sps:$4 sm:$0xff]   ;;  %v1661_v21 = vld [vmem:[#allocation7 + $0x174] ss:$8 sps:$4 sm:$0xff]   ;;  %v1646_v23 = vld [vmem:[#allocation7 + $0x44] ss:$8 sps:$4 sm:$0xff]  }
  0x54   :  { %1594 = vmatprep.subr.bf16.mxu1 %v1981_v0  ;;  %242 = vmatprep.subr.bf16.mxu0 %v1626_v8  ;;  %v1641_v22 = vld [vmem:[#allocation7 + $0x50] ss:$8 sps:$4 sm:$0xff]   ;;  %v1667_v24 = vld [vmem:[#allocation7 + $0x164] ss:$8 sps:$4 sm:$0xff]   ;;  %v1665_v25 = vld [vmem:[#allocation7 + $0x160] ss:$8 sps:$4 sm:$0xff]  }
  0x55   :  { %v1673_v26 = vld [vmem:[#allocation7 + $0x154] ss:$8 sps:$4 sm:$0xff]   ;;  %v1644_v27 = vld [vmem:[#allocation7 + $0x40] ss:$8 sps:$4 sm:$0xff]   ;;  %v1671_v29 = vld [vmem:[#allocation7 + $0x150] ss:$8 sps:$4 sm:$0xff]  }
  0x56   :  { %v1649_v28 = vld [vmem:[#allocation7 + $0x34] ss:$8 sps:$4 sm:$0xff]   ;;  %v1679_v30 = vld [vmem:[#allocation7 + $0x144] ss:$8 sps:$4 sm:$0xff]   ;;  %v1647_v31 = vld [vmem:[#allocation7 + $0x30] ss:$8 sps:$4 sm:$0xff]  }
  0x57   :  { %1595 = vmatpush3.bf16.msra.mxu1 %v1628_v9  ;;  %243 = vmatpush1.bf16.msra.mxu0 %v1629_v10  ;;  %v1652_v32 = vld [vmem:[#allocation7 + $0x24] ss:$8 sps:$4 sm:$0xff]   ;;  %v1677_v33 = vld [vmem:[#allocation7 + $0x140] ss:$8 sps:$4 sm:$0xff]   ;;  %v1685_v34 = vld [vmem:[#allocation7 + $0x134] ss:$8 sps:$4 sm:$0xff]  }
  0x58   :  { %1596 = vmatprep.subr.bf16.mxu1 %v1981_v0  ;;  %244 = vmatprep.subr.bf16.mxu0 %v1630_v11  ;;  %v1650_v35 = vld [vmem:[#allocation7 + $0x20] ss:$8 sps:$4 sm:$0xff]   ;;  %v1655_v36 = vld [vmem:[#allocation7 + $0x14] ss:$8 sps:$4 sm:$0xff]   ;;  %v1683_v37 = vld [vmem:[#allocation7 + $0x130] ss:$8 sps:$4 sm:$0xff]   ;;  %v142_v0 = vlaneseq }
  0x59   :  { %v1691_v38 = vld [vmem:[#allocation7 + $0x124] ss:$8 sps:$4 sm:$0xff]   ;;  %v1653_v39 = vld [vmem:[#allocation7 + $0x10] ss:$8 sps:$4 sm:$0xff]   ;;  %v1689_v41 = vld [vmem:[#allocation7 + $0x120] ss:$8 sps:$4 sm:$0xff]  }
  0x5a   :  { %v1658_v40 = vld [vmem:[#allocation7 + $0x4] ss:$8 sps:$4 sm:$0xff]   ;;  %v1656_v42 = vld [vmem:[#allocation7] ss:$8 sps:$4 sm:$0xff]   ;;  %v1664_v43 = vld [vmem:[#allocation7 + $0xf4] ss:$8 sps:$4 sm:$0xff]  }
  0x5b   :  { %1597 = vmatpush3.bf16.msra.mxu1 %v1632_v12  ;;  %245 = vmatpush1.bf16.msra.mxu0 %v1633_v13  ;;  %v1662_v44 = vld [vmem:[#allocation7 + $0xf0] ss:$8 sps:$4 sm:$0xff]   ;;  %v1670_v45 = vld [vmem:[#allocation7 + $0xe4] ss:$8 sps:$4 sm:$0xff]   ;;  %v1668_v46 = vld [vmem:[#allocation7 + $0xe0] ss:$8 sps:$4 sm:$0xff]  }
  0x5c   :  { %623 = vmatprep.subr.bf16.mxu0 %v1637_v14  ;;  %666 = vmatprep.subr.bf16.mxu1 %v1661_v21  ;;  %v1676_v47 = vld [vmem:[#allocation7 + $0xd4] ss:$8 sps:$4 sm:$0xff]   ;;  %v1674_v48 = vld [vmem:[#allocation7 + $0xd0] ss:$8 sps:$4 sm:$0xff]   ;;  %v1682_v49 = vld [vmem:[#allocation7 + $0xc4] ss:$8 sps:$4 sm:$0xff]  }
  0x5d   :  { %v1680_v50 = vld [vmem:[#allocation7 + $0xc0] ss:$8 sps:$4 sm:$0xff]   ;;  %v1688_v51 = vld [vmem:[#allocation7 + $0xb4] ss:$8 sps:$4 sm:$0xff]   ;;  %v1686_v52 = vld [vmem:[#allocation7 + $0xb0] ss:$8 sps:$4 sm:$0xff]  }
  0x5e   :  { %1599 = vmatmul.mubr.msk.bf16.vlgmr.msra.gmra.mxu1 %vm226_vm1, %v1634_v15  ;;  %1432 = vmatmul.mubr.msk.bf16.vlgmr.msra.gmra.mxu0 %vm226_vm1, %v1634_v15  ;;  %v1694_v53 = vld [vmem:[#allocation7 + $0xa4] ss:$8 sps:$4 sm:$0xff]   ;;  %v1697_v54 = vld [vmem:[#allocation7 + $0x114] ss:$8 sps:$4 sm:$0xff]   ;;  %v1692_v55 = vld [vmem:[#allocation7 + $0xa0] ss:$8 sps:$4 sm:$0xff]  }
  0x5f   :  { %698 = vmatprep.mubr.bf16.mxu1 %v1983_v1  ;;  %624 = vmatpush1.bf16.msra.mxu0 %v1635_v16  ;;  %v1695_v56 = vld [vmem:[#allocation7 + $0x110] ss:$8 sps:$4 sm:$0xff]   ;;  %v1700_v57 = vld [vmem:[#allocation7 + $0x94] ss:$8 sps:$4 sm:$0xff]   ;;  %v1703_v58 = vld [vmem:[#allocation7 + $0x104] ss:$8 sps:$4 sm:$0xff]  }
  0x60   :  { %625 = vmatprep.subr.bf16.mxu0 %v1640_v17  ;;  %667 = vmatpush1.bf16.msra.mxu1 %v1659_v20  ;;  %v1698_v59 = vld [vmem:[#allocation7 + $0x90] ss:$8 sps:$4 sm:$0xff]   ;;  %v1701_v60 = vld [vmem:[#allocation7 + $0x100] ss:$8 sps:$4 sm:$0xff]   ;;  %v1706_v61 = vld [vmem:[#allocation7 + $0x84] ss:$8 sps:$4 sm:$0xff]  }
  0x61   :  { %668 = vmatprep.subr.bf16.mxu1 %v1667_v24  ;;  %v1704_v62 = vld [vmem:[#allocation7 + $0x80] ss:$8 sps:$4 sm:$0xff]   ;;  %v1709_v63 = vld [vmem:[#allocation8 + $0x74] ss:$8 sps:$4 sm:$0xff]   ;;  %v143_v1 = vshrl.u32 %v142_v0, 7  ;;  %s1404_s17 = sshll.u32 %s1984_s16, 4  ;;  %s1405_s17 = int_to_ptr.vmem [resolvable:$true] %s1404_s17 }
  0x62   :  { %v140_v3 = vld [vmem:[%s2113_s2] sm:$0x7]  ;;  %v1757_v0 = vld [vmem:[#allocation10 + $0x74] ss:$8 sps:$4 sm:$0xff]   ;;  %s1939_s18 = scalar_lea.vmem %s1405_s17, 256  ;;  %p1944_p3 = scmp.lt.s32.totalorder %s1405_s17, %s1405_s17 }
  0x63   :  { %626 = vmatpush1.bf16.msra.mxu0 %v1638_v18  ;;  %v152_v2 = vsub.s32 2, %v143_v1  ;;  %v2081_v5 = vsub.s32 1, %v143_v1  ;;  %v2083_v6 = vsub.s32 0, %v143_v1  ;;  %v1760_v1 = vld [vmem:[#allocation10 + $0x64] ss:$8 sps:$4 sm:$0xff]   ;;  %p1940_p2 = scmp.ne.s32.totalorder %s1405_s17, %s1939_s18  ;;  %p1945_p4 = scmp.lt.s32.totalorder %s1939_s18, %s1939_s18 }
  0x64   :  { %627 = vmatprep.subr.bf16.mxu0 %v1643_v19  ;;  %669 = vmatpush1.bf16.msra.mxu1 %v1665_v25  ;;  %v1707_v25 = vld [vmem:[#allocation8 + $0x70] ss:$8 sps:$4 sm:$0xff]  }
  0x65   :  { %670 = vmatprep.subr.bf16.mxu1 %v1673_v26  ;;  %v153_v4 = vrot.slane %v140_v3, %v152_v2  ;;  %v149_v11 = vrot.slane %v140_v3, %v2081_v5  ;;  %v145_v12 = vrot.slane %v140_v3, %v2083_v6  ;;  %v1758_v2 = vld [vmem:[#allocation10 + $0x60] ss:$8 sps:$4 sm:$0xff]   ;;  %v1763_v3 = vld [vmem:[#allocation10 + $0x54] ss:$8 sps:$4 sm:$0xff]   ;;  %p1946_p5 = por %p1945_p4, %p1944_p3 }
  0x67   :  { %628 = vmatpush1.bf16.msra.mxu0 %v1641_v22  ;;  %p1947_p6 = pnand %p1946_p5, %p1940_p2 }
  0x68   :  { %629 = vmatprep.subr.bf16.mxu0 %v1646_v23  ;;  %671 = vmatpush1.bf16.msra.mxu1 %v1671_v29 }
  0x69   :  { %672 = vmatprep.subr.bf16.mxu1 %v1679_v30 }
  0x6b   :  { %630 = vmatpush1.bf16.msra.mxu0 %v1644_v27 }
  0x6c   :  { %631 = vmatprep.subr.bf16.mxu0 %v1649_v28  ;;  %673 = vmatpush1.bf16.msra.mxu1 %v1677_v33  ;;  %v1712_v28 = vld [vmem:[#allocation8 + $0x64] ss:$8 sps:$4 sm:$0xff]   ;;  %v1710_v33 = vld [vmem:[#allocation8 + $0x60] ss:$8 sps:$4 sm:$0xff]  }
  0x6d   :  { %674 = vmatprep.subr.bf16.mxu1 %v1685_v34 }
  0x6f   :  { %632 = vmatpush1.bf16.msra.mxu0 %v1647_v31 }
  0x70   :  { %633 = vmatprep.subr.bf16.mxu0 %v1652_v32  ;;  %675 = vmatpush1.bf16.msra.mxu1 %v1683_v37  ;;  %v1718_v37 = vld [vmem:[#allocation8 + $0x44] ss:$8 sps:$4 sm:$0xff]  }
  0x71   :  { %676 = vmatprep.subr.bf16.mxu1 %v1691_v38  ;;  %v1716_v38 = vld [vmem:[#allocation8 + $0x40] ss:$8 sps:$4 sm:$0xff]  }
  0x73   :  { %634 = vmatpush1.bf16.msra.mxu0 %v1650_v35  ;;  %v1715_v35 = vld [vmem:[#allocation8 + $0x54] ss:$8 sps:$4 sm:$0xff]  }
  0x74   :  { %635 = vmatprep.subr.bf16.mxu0 %v1655_v36  ;;  %677 = vmatpush1.bf16.msra.mxu1 %v1689_v41  ;;  %v1713_v36 = vld [vmem:[#allocation8 + $0x50] ss:$8 sps:$4 sm:$0xff]   ;;  %v1724_v41 = vld [vmem:[#allocation8 + $0x24] ss:$8 sps:$4 sm:$0xff]  }
  0x75   :  { %678 = vmatprep.subr.bf16.mxu1 %v1697_v54  ;;  %v1740_v54 = vld [vmem:[#allocation8 + $0xc0] ss:$8 sps:$4 sm:$0xff]  }
  0x77   :  { %636 = vmatpush1.bf16.msra.mxu0 %v1653_v39  ;;  %v1721_v39 = vld [vmem:[#allocation8 + $0x34] ss:$8 sps:$4 sm:$0xff]  }
  0x78   :  { %637 = vmatprep.subr.bf16.mxu0 %v1658_v40  ;;  %679 = vmatpush1.bf16.msra.mxu1 %v1695_v56  ;;  %v1719_v40 = vld [vmem:[#allocation8 + $0x30] ss:$8 sps:$4 sm:$0xff]  }
  0x79   :  { %680 = vmatprep.subr.bf16.mxu1 %v1703_v58  ;;  %v1743_v56 = vld [vmem:[#allocation8 + $0xb0] ss:$8 sps:$4 sm:$0xff]   ;;  %v1746_v58 = vld [vmem:[#allocation8 + $0xa0] ss:$8 sps:$4 sm:$0xff]  }
  0x7b   :  { %638 = vmatpush1.bf16.msra.mxu0 %v1656_v42  ;;  %v1722_v42 = vld [vmem:[#allocation8 + $0x20] ss:$8 sps:$4 sm:$0xff]  }
  0x7c   :  { %639 = vmatprep.subr.bf16.mxu0 %v1664_v43  ;;  %681 = vmatpush1.bf16.msra.mxu1 %v1701_v60  ;;  %v1727_v43 = vld [vmem:[#allocation8 + $0x14] ss:$8 sps:$4 sm:$0xff]   ;;  %v1749_v60 = vld [vmem:[#allocation8 + $0x90] ss:$8 sps:$4 sm:$0xff]  }
  0x7d   :  { %919 = vmatprep.subr.bf16.mxu1 %v1709_v63  ;;  %v1755_v63 = vld [vmem:[#allocation10 + $0x70] ss:$8 sps:$4 sm:$0xff]  }
  0x7f   :  { %640 = vmatpush2.bf16.msra.mxu0 %v1662_v44  ;;  %v1725_v44 = vld [vmem:[#allocation8 + $0x10] ss:$8 sps:$4 sm:$0xff]  }
  0x80   :  { %641 = vmatprep.subr.bf16.mxu0 %v1670_v45  ;;  %v1730_v45 = vld [vmem:[#allocation8 + $0x4] ss:$8 sps:$4 sm:$0xff]  }
  0x83   :  { %642 = vmatpush2.bf16.msra.mxu0 %v1668_v46  ;;  %v1728_v46 = vld [vmem:[#allocation8] ss:$8 sps:$4 sm:$0xff]  }
  0x84   :  { %643 = vmatprep.subr.bf16.mxu0 %v1676_v47  ;;  %v1733_v47 = vld [vmem:[#allocation8 + $0xf4] ss:$8 sps:$4 sm:$0xff]  }
  0x87   :  { %644 = vmatpush2.bf16.msra.mxu0 %v1674_v48  ;;  %v1731_v48 = vld [vmem:[#allocation8 + $0xf0] ss:$8 sps:$4 sm:$0xff]  }
  0x88   :  { %645 = vmatprep.subr.bf16.mxu0 %v1682_v49  ;;  %v1736_v49 = vld [vmem:[#allocation8 + $0xe4] ss:$8 sps:$4 sm:$0xff]  }
  0x8b   :  { %646 = vmatpush2.bf16.msra.mxu0 %v1680_v50  ;;  %v1734_v50 = vld [vmem:[#allocation8 + $0xe0] ss:$8 sps:$4 sm:$0xff]  }
  0x8c   :  { %647 = vmatprep.subr.bf16.mxu0 %v1688_v51  ;;  %v1739_v51 = vld [vmem:[#allocation8 + $0xd4] ss:$8 sps:$4 sm:$0xff]  }
  0x8f   :  { %648 = vmatpush2.bf16.msra.mxu0 %v1686_v52  ;;  %v1737_v52 = vld [vmem:[#allocation8 + $0xd0] ss:$8 sps:$4 sm:$0xff]  }
  0x90   :  { %649 = vmatprep.subr.bf16.mxu0 %v1694_v53  ;;  %v1742_v53 = vld [vmem:[#allocation8 + $0xc4] ss:$8 sps:$4 sm:$0xff]  }
  0x93   :  { %650 = vmatpush2.bf16.msra.mxu0 %v1692_v55  ;;  %v1745_v55 = vld [vmem:[#allocation8 + $0xb4] ss:$8 sps:$4 sm:$0xff]  }
  0x94   :  { %651 = vmatprep.subr.bf16.mxu0 %v1700_v57  ;;  %v1748_v57 = vld [vmem:[#allocation8 + $0xa4] ss:$8 sps:$4 sm:$0xff]  }
  0x97   :  { %652 = vmatpush2.bf16.msra.mxu0 %v1698_v59  ;;  %v1751_v59 = vld [vmem:[#allocation8 + $0x94] ss:$8 sps:$4 sm:$0xff]  }
  0x98   :  { %653 = vmatprep.subr.bf16.mxu0 %v1706_v61  ;;  %v1754_v61 = vld [vmem:[#allocation8 + $0x84] ss:$8 sps:$4 sm:$0xff]  }
  0x9b   :  { %654 = vmatpush2.bf16.msra.mxu0 %v1704_v62  ;;  %v1752_v62 = vld [vmem:[#allocation8 + $0x80] ss:$8 sps:$4 sm:$0xff]  }
  0x9c   :  { %1172 = vmatprep.subr.bf16.mxu0 %v1757_v0  ;;  %v1809_v0 = vld [vmem:[#allocation11 + $0x60] sm:$0xff]  }
 0x11e   :  { %v307_v7 = vpop.f32.mrf.mxu1  ;;  %v264_v9 = vpop.f32.mrf.mxu0 }
 0x11f   :  { %v308_v8 = vadd.f32 %v307_v7, %v153_v4  ;;  %v265_v21 = vadd.f32 %v264_v9, %v145_v12  ;;  %v1766_v7 = vld [vmem:[#allocation10 + $0x44] ss:$8 sps:$4 sm:$0xff]   ;;  %v1769_v9 = vld [vmem:[#allocation10 + $0x34] ss:$8 sps:$4 sm:$0xff]  }
 0x120   :  { %v1600_v10 = vpop.f32.mrf.mxu1  ;;  %v266_v13 = vpop.f32.mrf.mxu0 }
 0x121   :  { %v316_v15 = vmax.f32 %v308_v8, 0.0  ;;  %v267_v18 = vadd.f32 %v266_v13, %v149_v11  ;;  %v314_v31 = vmax.f32 %v265_v21, 0.0  ;;  %v1764_v8 = vld [vmem:[#allocation10 + $0x40] ss:$8 sps:$4 sm:$0xff]   ;;  %v1767_v10 = vld [vmem:[#allocation10 + $0x30] ss:$8 sps:$4 sm:$0xff]  }
 0x122   :  { %v310_v14 = vpop.f32.mrf.mxu1  ;;  %v268_v17 = vpop.f32.mrf.mxu0  ;;  %v1775_v13 = vld [vmem:[#allocation10 + $0x14] ss:$8 sps:$4 sm:$0xff]  }
 0x123   :  { %v311_v16 = vadd.f32 %v310_v14, %v153_v4  ;;  %v269_v19 = vadd.f32 %v268_v17, %v145_v12  ;;  %v315_v29 = vmax.f32 %v267_v18, 0.0  ;;  %v1761_v4 = vld [vmem:[#allocation10 + $0x50] ss:$8 sps:$4 sm:$0xff]   ;;  %v1770_v12 = vld [vmem:[#allocation10 + $0x20] ss:$8 sps:$4 sm:$0xff]  }
 0x124   :  { %v1601_v20 = vpop.f32.mrf.mxu1  ;;  %v270_v23 = vpop.f32.mrf.mxu0  ;;  %v1773_v14 = vld [vmem:[#allocation10 + $0x10] ss:$8 sps:$4 sm:$0xff]   ;;  %v1781_v17 = vld [vmem:[#allocation10 + $0xf4] ss:$8 sps:$4 sm:$0xff]  }
 0x125   :  { %v319_v22 = vmax.f32 %v311_v16, 0.0  ;;  %v271_v24 = vadd.f32 %v270_v23, %v149_v11  ;;  %v317_v27 = vmax.f32 %v269_v19, 0.0  ;;  %v1772_v11 = vld [vmem:[#allocation10 + $0x24] ss:$8 sps:$4 sm:$0xff]   ;;  %v1776_v16 = vld [vmem:[#allocation10] ss:$8 sps:$4 sm:$0xff]  }
 0x126   :  { %v1779_v18 = vld [vmem:[#allocation10 + $0xf0] ss:$8 sps:$4 sm:$0xff]   ;;  %v1784_v19 = vld [vmem:[#allocation10 + $0xe4] ss:$8 sps:$4 sm:$0xff]   ;;  %v1782_v20 = vld [vmem:[#allocation10 + $0xe0] ss:$8 sps:$4 sm:$0xff]  }
 0x127   :  { %v322_v26 = vpack.c.bf16 %v319_v22, %v316_v15  ;;  %v318_v30 = vmax.f32 %v271_v24, 0.0  ;;  %v320_v34 = vpack.c.bf16 %v317_v27, %v314_v31  ;;  %v1778_v15 = vld [vmem:[#allocation10 + $0x4] ss:$8 sps:$4 sm:$0xff]   ;;  %v1787_v21 = vld [vmem:[#allocation10 + $0xd4] ss:$8 sps:$4 sm:$0xff]  }
 0x128   :  { %v1785_v22 = vld [vmem:[#allocation10 + $0xd0] ss:$8 sps:$4 sm:$0xff]   ;;  %v1790_v23 = vld [vmem:[#allocation10 + $0xc4] ss:$8 sps:$4 sm:$0xff]   ;;  %v1788_v24 = vld [vmem:[#allocation10 + $0xc0] ss:$8 sps:$4 sm:$0xff]  }
 0x129   :  { %699 = vmatmul.mubr.bf16.vlgmr.msra.gmra.mxu1 %v322_v26  ;;  %v321_v32 = vpack.c.bf16 %v318_v30, %v315_v29  ;;  %v1791_v26 = vld [vmem:[#allocation10 + $0xb0] ss:$8 sps:$4 sm:$0xff]  }
 0x12a   :  { %920 = vmatpush1.bf16.msra.mxu1 %v1707_v25  ;;  %v1793_v25 = vld [vmem:[#allocation10 + $0xb4] ss:$8 sps:$4 sm:$0xff]  }
 0x12b   :  { %921 = vmatprep.subr.bf16.mxu1 %v1712_v28  ;;  %655 = vmatprep.mubr.bf16.mxu0 %v321_v32  ;;  %v371_v28 = vld [vmem:[%s2115_s4] sm:$0x3] }
 0x12c   :  { %656 = vmatmul.mubr.bf16.vlgmr.msra.gmra.mxu0 %v320_v34  ;;  %v380_v29 = vrot.slane %v371_v28, %v2081_v5  ;;  %v376_v31 = vrot.slane %v371_v28, %v2083_v6  ;;  %v1818_v28 = vld [vmem:[#allocation11] sm:$0xff]  }
 0x12d   :  { %1173 = vmatpush1.bf16.msra.mxu0 %v1755_v63  ;;  %v1808_v63 = vld [vmem:[#allocation11 + $0x28] sm:$0xff]  }
 0x12e   :  { %922 = vmatpush1.bf16.msra.mxu1 %v1710_v33  ;;  %1174 = vmatprep.subr.bf16.mxu0 %v1760_v1  ;;  %v1810_v1 = vld [vmem:[#allocation11 + $0x20] sm:$0xff]  }
 0x12f   :  { %923 = vmatprep.subr.bf16.mxu1 %v1715_v35 }
 0x131   :  { %1175 = vmatpush1.bf16.msra.mxu0 %v1758_v2  ;;  %v1811_v2 = vld [vmem:[#allocation11 + $0x58] sm:$0xff]  }
 0x132   :  { %924 = vmatpush1.bf16.msra.mxu1 %v1713_v36  ;;  %1176 = vmatprep.subr.bf16.mxu0 %v1763_v3  ;;  %v1812_v3 = vld [vmem:[#allocation11 + $0x18] sm:$0xff]  }
 0x133   :  { %925 = vmatprep.subr.bf16.mxu1 %v1718_v37 }
 0x135   :  { %1177 = vmatpush1.bf16.msra.mxu0 %v1761_v4  ;;  %v747_v4 = vld [vmem:[%s2117_s6] sm:$0x3] }
 0x136   :  { %926 = vmatpush1.bf16.msra.mxu1 %v1716_v38  ;;  %1178 = vmatprep.subr.bf16.mxu0 %v1766_v7 }
 0x137   :  { %927 = vmatprep.subr.bf16.mxu1 %v1721_v39 }
 0x139   :  { %1179 = vmatpush1.bf16.msra.mxu0 %v1764_v8  ;;  %v756_v8 = vrot.slane %v747_v4, %v2081_v5 }
 0x13a   :  { %928 = vmatpush1.bf16.msra.mxu1 %v1719_v40  ;;  %1180 = vmatprep.subr.bf16.mxu0 %v1769_v9  ;;  %v752_v9 = vrot.slane %v747_v4, %v2083_v6 }
 0x13b   :  { %929 = vmatprep.subr.bf16.mxu1 %v1724_v41 }
 0x13d   :  { %1181 = vmatpush1.bf16.msra.mxu0 %v1767_v10 }
 0x13e   :  { %930 = vmatpush1.bf16.msra.mxu1 %v1722_v42  ;;  %1182 = vmatprep.subr.bf16.mxu0 %v1772_v11 }
 0x13f   :  { %931 = vmatprep.subr.bf16.mxu1 %v1727_v43 }
 0x141   :  { %1183 = vmatpush1.bf16.msra.mxu0 %v1770_v12 }
 0x142   :  { %932 = vmatpush1.bf16.msra.mxu1 %v1725_v44  ;;  %1184 = vmatprep.subr.bf16.mxu0 %v1775_v13 }
 0x143   :  { %933 = vmatprep.subr.bf16.mxu1 %v1730_v45 }
 0x145   :  { %1185 = vmatpush1.bf16.msra.mxu0 %v1773_v14 }
 0x146   :  { %934 = vmatpush1.bf16.msra.mxu1 %v1728_v46  ;;  %1186 = vmatprep.subr.bf16.mxu0 %v1778_v15 }
 0x147   :  { %935 = vmatprep.subr.bf16.mxu1 %v1733_v47 }
 0x149   :  { %1187 = vmatpush1.bf16.msra.mxu0 %v1776_v16 }
 0x14a   :  { %936 = vmatpush2.bf16.msra.mxu1 %v1731_v48  ;;  %1188 = vmatprep.subr.bf16.mxu0 %v1781_v17 }
 0x14b   :  { %937 = vmatprep.subr.bf16.mxu1 %v1736_v49 }
 0x14d   :  { %1189 = vmatpush2.bf16.msra.mxu0 %v1779_v18 }
 0x14e   :  { %938 = vmatpush2.bf16.msra.mxu1 %v1734_v50  ;;  %1190 = vmatprep.subr.bf16.mxu0 %v1784_v19 }
 0x14f   :  { %939 = vmatprep.subr.bf16.mxu1 %v1739_v51 }
 0x151   :  { %1191 = vmatpush2.bf16.msra.mxu0 %v1782_v20 }
 0x152   :  { %940 = vmatpush2.bf16.msra.mxu1 %v1737_v52  ;;  %1192 = vmatprep.subr.bf16.mxu0 %v1787_v21  ;;  %v1796_v52 = vld [vmem:[#allocation10 + $0xa4] ss:$8 sps:$4 sm:$0xff]  }
 0x153   :  { %941 = vmatprep.subr.bf16.mxu1 %v1742_v53  ;;  %v1794_v53 = vld [vmem:[#allocation10 + $0xa0] ss:$8 sps:$4 sm:$0xff]  }
 0x155   :  { %1193 = vmatpush2.bf16.msra.mxu0 %v1785_v22 }
 0x156   :  { %942 = vmatpush2.bf16.msra.mxu1 %v1740_v54  ;;  %1194 = vmatprep.subr.bf16.mxu0 %v1790_v23  ;;  %v1799_v54 = vld [vmem:[#allocation10 + $0x94] ss:$8 sps:$4 sm:$0xff]  }
 0x157   :  { %943 = vmatprep.subr.bf16.mxu1 %v1745_v55  ;;  %v1797_v55 = vld [vmem:[#allocation10 + $0x90] ss:$8 sps:$4 sm:$0xff]  }
 0x158   :  { %v1813_v23 = vld [vmem:[#allocation11 + $0x50] sm:$0xff]  }
 0x159   :  { %1195 = vmatpush2.bf16.msra.mxu0 %v1788_v24  ;;  %v1814_v24 = vld [vmem:[#allocation11 + $0x10] sm:$0xff]  }
 0x15a   :  { %944 = vmatpush2.bf16.msra.mxu1 %v1743_v56  ;;  %1196 = vmatprep.subr.bf16.mxu0 %v1793_v25  ;;  %v1802_v56 = vld [vmem:[#allocation10 + $0x84] ss:$8 sps:$4 sm:$0xff]  }
 0x15b   :  { %945 = vmatprep.subr.bf16.mxu1 %v1748_v57  ;;  %v1800_v57 = vld [vmem:[#allocation10 + $0x80] ss:$8 sps:$4 sm:$0xff]  }
 0x15c   :  { %v1815_v25 = vld [vmem:[#allocation11 + $0x48] sm:$0xff]  }
 0x15d   :  { %1197 = vmatpush2.bf16.msra.mxu0 %v1791_v26  ;;  %v1816_v26 = vld [vmem:[#allocation11 + $0x8] sm:$0xff]  }
 0x15e   :  { %946 = vmatpush2.bf16.msra.mxu1 %v1746_v58  ;;  %1198 = vmatprep.subr.bf16.mxu0 %v1796_v52  ;;  %v1803_v58 = vld [vmem:[#allocation11 + $0x78] sm:$0xff]  }
 0x15f   :  { %947 = vmatprep.subr.bf16.mxu1 %v1751_v59  ;;  %v1804_v59 = vld [vmem:[#allocation11 + $0x38] sm:$0xff]  }
 0x161   :  { %1199 = vmatpush2.bf16.msra.mxu0 %v1794_v53 }
 0x162   :  { %948 = vmatpush2.bf16.msra.mxu1 %v1749_v60  ;;  %1200 = vmatprep.subr.bf16.mxu0 %v1799_v54  ;;  %v1805_v60 = vld [vmem:[#allocation11 + $0x70] sm:$0xff]  }
 0x163   :  { %949 = vmatprep.subr.bf16.mxu1 %v1754_v61  ;;  %v1806_v61 = vld [vmem:[#allocation11 + $0x30] sm:$0xff]  }
 0x165   :  { %1201 = vmatpush2.bf16.msra.mxu0 %v1797_v55 }
 0x166   :  { %950 = vmatpush2.bf16.msra.mxu1 %v1752_v62  ;;  %1202 = vmatprep.subr.bf16.mxu0 %v1802_v56  ;;  %v1807_v62 = vld [vmem:[#allocation11 + $0x68] sm:$0xff]  }
 0x167   :  { %1568 = vmatprep.subr.bf16.mxu1 %v1803_v58 }
 0x169   :  { %1203 = vmatpush2.bf16.msra.mxu0 %v1800_v57 }
 0x1e9   :  { %v700_v27 = vpop.f32.mrf.mxu1 }
 0x1eb   :  { %v702_v30 = vpop.f32.mrf.mxu1 }
 0x1ec   :  { %v657_v32 = vpop.f32.mrf.mxu0 }
 0x1ed   :  { %v658_v35 = vadd.f32 %v657_v32, %v376_v31  ;;  %v704_v36 = vpop.f32.mrf.mxu1 }
 0x1ee   :  { %v659_v33 = vpop.f32.mrf.mxu0 }
 0x1ef   :  { %v660_v34 = vadd.f32 %v659_v33, %v380_v29  ;;  %v701_v43 = vadd.f32 %v700_v27, %v658_v35  ;;  %v706_v44 = vpop.f32.mrf.mxu1  ;;  %v1817_v27 = vld [vmem:[#allocation11 + $0x40] sm:$0xff]  }
 0x1f0   :  { %v661_v37 = vpop.f32.mrf.mxu0 }
 0x1f1   :  { %v662_v38 = vadd.f32 %v661_v37, %v376_v31  ;;  %v703_v40 = vadd.f32 %v702_v30, %v660_v34  ;;  %v709_v49 = vmax.f32 %v701_v43, 0.0 }
 0x1f2   :  { %v663_v39 = vpop.f32.mrf.mxu0 }
 0x1f3   :  { %v705_v41 = vadd.f32 %v704_v36, %v662_v38  ;;  %v664_v42 = vadd.f32 %v663_v39, %v380_v29  ;;  %v710_v47 = vmax.f32 %v703_v40, 0.0  ;;  %v1000_v29 = vld [vmem:[%s2119_s8] sm:$0x3] }
 0x1f4   :  { %v1009_v31 = vrot.slane %v1000_v29, %v2081_v5  ;;  %v1005_v32 = vrot.slane %v1000_v29, %v2083_v6  ;;  %v1546_v5 = vld [vmem:[%s2121_s10] ss:$0 sm:$0xff] }
 0x1f5   :  { %v707_v45 = vadd.f32 %v706_v44, %v664_v42  ;;  %v711_v46 = vmax.f32 %v705_v41, 0.0 }
 0x1f7   :  { %v712_v48 = vmax.f32 %v707_v45, 0.0  ;;  %v713_v51 = vpack.c.bf16 %v711_v46, %v709_v49 }
 0x1f9   :  { %v714_v50 = vpack.c.bf16 %v712_v48, %v710_v47 }
 0x1fb   :  { %951 = vmatprep.mubr.bf16.mxu1 %v714_v50 }
 0x1fc   :  { %952 = vmatmul.mubr.bf16.vlgmr.msra.gmra.mxu1 %v713_v51 }
 0x1fd   :  { %1569 = vmatpush3.bf16.msra.mxu1 %v1804_v59 }
 0x1fe   :  { %1570 = vmatprep.subr.bf16.mxu1 %v1805_v60 }
 0x201   :  { %1571 = vmatpush3.bf16.msra.mxu1 %v1806_v61 }
 0x202   :  { %1572 = vmatprep.subr.bf16.mxu1 %v1807_v62 }
 0x205   :  { %1573 = vmatpush3.bf16.msra.mxu1 %v1808_v63 }
 0x206   :  { %1574 = vmatprep.subr.bf16.mxu1 %v1809_v0 }
 0x209   :  { %1575 = vmatpush3.bf16.msra.mxu1 %v1810_v1 }
 0x20a   :  { %1576 = vmatprep.subr.bf16.mxu1 %v1811_v2 }
 0x20d   :  { %1577 = vmatpush3.bf16.msra.mxu1 %v1812_v3 }
 0x20e   :  { %1578 = vmatprep.subr.bf16.mxu1 %v1813_v23 }
 0x211   :  { %1579 = vmatpush3.bf16.msra.mxu1 %v1814_v24 }
 0x212   :  { %1580 = vmatprep.subr.bf16.mxu1 %v1815_v25 }
 0x215   :  { %1581 = vmatpush3.bf16.msra.mxu1 %v1816_v26 }
 0x216   :  { %1582 = vmatprep.subr.bf16.mxu1 %v1817_v27 }
 0x219   :  { %1583 = vmatpush3.bf16.msra.mxu1 %v1818_v28 }
 0x2bc   :  { %v953_v7 = vpop.f32.mrf.mxu1 }
 0x2bd   :  { %v954_v14 = vadd.f32 %v953_v7, %v752_v9 }
 0x2be   :  { %v955_v10 = vpop.f32.mrf.mxu1 }
 0x2bf   :  { %v956_v12 = vadd.f32 %v955_v10, %v756_v8  ;;  %v962_v20 = vmax.f32 %v954_v14, 0.0 }
 0x2c0   :  { %v957_v11 = vpop.f32.mrf.mxu1 }
 0x2c1   :  { %v958_v13 = vadd.f32 %v957_v11, %v752_v9  ;;  %v963_v18 = vmax.f32 %v956_v12, 0.0 }
 0x2c2   :  { %v959_v15 = vpop.f32.mrf.mxu1 }
 0x2c3   :  { %v960_v16 = vadd.f32 %v959_v15, %v756_v8  ;;  %v964_v17 = vmax.f32 %v958_v13, 0.0 }
 0x2c5   :  { %v965_v19 = vmax.f32 %v960_v16, 0.0  ;;  %v966_v22 = vpack.c.bf16 %v964_v17, %v962_v20 }
 0x2c7   :  { %v967_v21 = vpack.c.bf16 %v965_v19, %v963_v18 }
 0x2c9   :  { %1204 = vmatprep.mubr.bf16.mxu0 %v967_v21 }
 0x2ca   :  { %1205 = vmatmul.mubr.bf16.vlgmr.msra.gmra.mxu0 %v966_v22 }
 0x38a   :  { %v1206_v30 = vpop.f32.mrf.mxu0 }
 0x38b   :  { %v1207_v37 = vadd.f32 %v1206_v30, %v1005_v32 }
 0x38c   :  { %v1208_v33 = vpop.f32.mrf.mxu0 }
 0x38d   :  { %v1209_v35 = vadd.f32 %v1208_v33, %v1009_v31  ;;  %v1215_v43 = vmax.f32 %v1207_v37, 0.0 }
 0x38e   :  { %v1210_v34 = vpop.f32.mrf.mxu0 }
 0x38f   :  { %v1211_v36 = vadd.f32 %v1210_v34, %v1005_v32  ;;  %v1216_v41 = vmax.f32 %v1209_v35, 0.0 }
 0x390   :  { %v1212_v38 = vpop.f32.mrf.mxu0 }
 0x391   :  { %v1213_v39 = vadd.f32 %v1212_v38, %v1009_v31  ;;  %v1217_v40 = vmax.f32 %v1211_v36, 0.0 }
 0x393   :  { %v1218_v42 = vmax.f32 %v1213_v39, 0.0  ;;  %v1219_v45 = vpack.c.bf16 %v1217_v40, %v1215_v43 }
 0x395   :  { %v1220_v44 = vpack.c.bf16 %v1218_v42, %v1216_v41 }
 0x397   :  { %1388 = vmatprep.mubr.bf16.mxu1 %v1220_v44 }
 0x398   :  { %1389 = vmatmul.mubr.bf16.vlgmr.msra.gmra.mxu1 %v1219_v45 }
 0x458   :  { %v1584_v46 = vpop.f32.mrf.mxu1 }
 0x45a   :  { %v1585_v6 = vpop.f32.mrf.mxu1 }
 0x45b   :  { %v1586_v47 = vadd.f32 %v1585_v6, %v1584_v46 }
 0x45c   :  { %v1587_v48 = vpop.f32.mrf.mxu1 }
 0x45d   :  { %v1391_v49 = vadd.f32 %v1586_v47, %v1546_v5 }
 0x45e   :  { %v1588_v50 = vpop.f32.mrf.mxu1 }
 0x45f   :  { %1397 = vst [vmem:[#allocation13] sm:$0xff] %v1391_v49  ;;  %v1589_v51 = vadd.f32 %v1588_v50, %v1587_v48 }
 0x461   :  { %v1394_v52 = vadd.f32 %v1589_v51, %v1546_v5 }
 0x463   :  { %1398 = vst [vmem:[#allocation13 + $0x8] sm:$0xff] %v1394_v52 }
 0x464   :  { %1950 = shalt.err (!%p1947_p6)
}
 0x465   :  { %1410 = dma.vmem_to_hbm [thread:$0]  %s1405_s17, 256, %s2122_s11, [#allocation4], %s1974_s29, %s1974_s29, %s1975_s30  }
 0x466   :  { %1967 = dma.done.wait [#allocation4], 256  }
 0x467   :  { %1968 = vsyncadd [#allocation4], 4294967040 }
 0x468   :  { %1414 = vsyncpa [#allocation3], 1 }
 0x469   :  { %1415 = vsyncpa [#allocation6], 1 }
 0x46a   :  { %1416 = vsyncpa [#allocation9], 1 }
 0x46b   :  { %1417 = vsyncpa [#allocation12], 1 }
 0x46c   :  { %1418 = vsyncpa [#allocation4], 1 }

// kernel: tpu_custom_call.1
= control target key start
LH: loop header
LB: loop body
LE: loop exit
PB: predicated region body
PF: predicated region fallthrough
CT: control target
= control target key end

     0   :  { %16 = vsyncpa [#allocation3], 0  ;;  %s2111_s0 = inlined_call_operand.hbm [shape: bf16[16,64], index: 0, kind: input, shape index: {}]   ;;  %s2112_s1 = inlined_call_operand.hbm [shape: bf16[64,384], index: 1, kind: input, shape index: {}]   ;;  %s2113_s2 = inlined_call_operand.vmem [shape: f32[1,384], index: 2, kind: input, shape index: {}]   ;;  %s2114_s3 = inlined_call_operand.hbm [shape: bf16[384,256], index: 3, kind: input, shape index: {}]   ;;  %s2115_s4 = inlined_call_operand.vmem [shape: f32[1,256], index: 4, kind: input, shape index: {}]   ;;  %s2116_s5 = inlined_call_operand.hbm [shape: bf16[256,256], index: 5, kind: input, shape index: {}]   ;;  %s2117_s6 = inlined_call_operand.vmem [shape: f32[1,256], index: 6, kind: input, shape index: {}]   ;;  %s2118_s7 = inlined_call_operand.hbm [shape: bf16[256,256], index: 7, kind: input, shape index: {}]   ;;  %s2119_s8 = inlined_call_operand.vmem [shape: f32[1,256], index: 8, kind: input, shape index: {}]   ;;  %s2120_s9 = inlined_call_operand.hbm [shape: bf16[256,128], index: 9, kind: input, shape index: {}]   ;;  %s2121_s10 = inlined_call_operand.vmem [shape: f32[1,128], index: 10, kind: input, shape index: {}]   ;;  %s2122_s11 = inlined_call_operand.hbm [shape: f32[16,128], index: 11, kind: output, shape index: {}]  }
   0x1   :  { %17 = vsyncpa [#allocation6], 0 }
   0x2   :  { %18 = vsyncpa [#allocation9], 0 }
   0x3   :  { %19 = vsyncpa [#allocation12], 0 }
   0x4   :  { %20 = vsyncpa [#allocation4], 0  ;;  %s1969_s17 = smov [#allocation5]  }
   0x5   :  { %s38_s18 = sshll.u32 %s1969_s17, 4  ;;  %s39_s18 = int_to_ptr.vmem [resolvable:$true] %s38_s18 }
   0x6   :  { %s1827_s19 = scalar_lea.vmem %s39_s18, 1536  ;;  %p1832_p1 = scmp.lt.s32.totalorder %s39_s18, %s39_s18 }
   0x7   :  { %p1828_p0 = scmp.ne.s32.totalorder %s39_s18, %s1827_s19  ;;  %p1833_p2 = scmp.lt.s32.totalorder %s1827_s19, %s1827_s19 }
   0x9   :  { %p1834_p3 = por %p1833_p2, %p1832_p1 }
   0xb   :  { %p1835_p4 = pnand %p1834_p3, %p1828_p0 }
   0xd   :  { %1838 = shalt.err (!%p1835_p4)
}
   0xe   :  { %s1970_s20 = smov 192   ;;  %s1971_s21 = smov 12  }
   0xf   :  { %44 = dma.hbm_to_vmem [thread:$0]  %s2112_s1, 1536, %s39_s18, [#allocation6], %s1970_s20, %s1970_s20, %s1971_s21  }
  0x10   :  { %s1972_s24 = smov [#allocation8]   ;;  %s1973_s26 = smov [#allocation2]  }
  0x11   :  { %s66_s25 = sshll.u32 %s1972_s24, 4  ;;  %s26_s27 = sshll.u32 %s1973_s26, 4  ;;  %s67_s25 = int_to_ptr.vmem [resolvable:$true] %s66_s25  ;;  %s27_s27 = int_to_ptr.vmem [resolvable:$true] %s26_s27 }
  0x12   :  { %s1847_s28 = scalar_lea.vmem %s67_s25, 4096  ;;  %p1852_p6 = scmp.lt.s32.totalorder %s67_s25, %s67_s25 }
  0x13   :  { %p1848_p5 = scmp.ne.s32.totalorder %s67_s25, %s1847_s28  ;;  %p1853_p7 = scmp.lt.s32.totalorder %s1847_s28, %s1847_s28 }
  0x15   :  { %p1854_p8 = por %p1853_p7, %p1852_p6 }
  0x17   :  { %p1855_p9 = pnand %p1854_p8, %p1848_p5 }
  0x19   :  { %1858 = shalt.err (!%p1855_p9)
}
  0x1a   :  { %s1974_s29 = smov 128   ;;  %s1975_s30 = smov 8  }
  0x1b   :  { %72 = dma.hbm_to_vmem [thread:$0]  %s2116_s5, 4096, %s67_s25, [#allocation9], %s1974_s29, %s1974_s29, %s1975_s30  }
  0x1c   :  { %s1867_s1 = scalar_lea.vmem %s27_s27, 128  ;;  %p1872_p11 = scmp.lt.s32.totalorder %s27_s27, %s27_s27 }
  0x1d   :  { %p1868_p10 = scmp.ne.s32.totalorder %s27_s27, %s1867_s1  ;;  %p1873_p12 = scmp.lt.s32.totalorder %s1867_s1, %s1867_s1 }
  0x1f   :  { %p1874_p13 = por %p1873_p12, %p1872_p11 }
  0x21   :  { %p1875_p0 = pnand %p1874_p13, %p1868_p10 }
  0x23   :  { %1878 = shalt.err (!%p1875_p0)
}
  0x24   :  { %s1976_s14 = smov 64   ;;  %s1977_s15 = smov 4  }
  0x25   :  { %32 = dma.hbm_to_vmem [thread:$0]  %s2111_s0, 128, %s27_s27, [#allocation3], %s1976_s14, %s1976_s14, %s1977_s15  }
  0x26   :  { %s1978_s18 = smov [#allocation7]   ;;  %s1979_s5 = smov [#allocation10]  }
  0x27   :  { %s52_s19 = sshll.u32 %s1978_s18, 4  ;;  %s80_s20 = sshll.u32 %s1979_s5, 4  ;;  %s53_s19 = int_to_ptr.vmem [resolvable:$true] %s52_s19  ;;  %s81_s20 = int_to_ptr.vmem [resolvable:$true] %s80_s20 }
  0x28   :  { %s1887_s21 = scalar_lea.vmem %s53_s19, 6144  ;;  %p1892_p2 = scmp.lt.s32.totalorder %s53_s19, %s53_s19 }
  0x29   :  { %p1888_p1 = scmp.ne.s32.totalorder %s53_s19, %s1887_s21  ;;  %p1893_p3 = scmp.lt.s32.totalorder %s1887_s21, %s1887_s21 }
  0x2b   :  { %p1894_p4 = por %p1893_p3, %p1892_p2 }
  0x2d   :  { %p1895_p5 = pnand %p1894_p4, %p1888_p1 }
  0x2f   :  { %1898 = shalt.err (!%p1895_p5)
}
  0x30   :  { %58 = dma.hbm_to_vmem [thread:$0]  %s2114_s3, 6144, %s53_s19, [#allocation6], %s1974_s29, %s1974_s29, %s1975_s30  }
  0x31   :  { %s1907_s0 = scalar_lea.vmem %s81_s20, 4096  ;;  %p1912_p7 = scmp.lt.s32.totalorder %s81_s20, %s81_s20 }
  0x32   :  { %p1908_p6 = scmp.ne.s32.totalorder %s81_s20, %s1907_s0  ;;  %p1913_p8 = scmp.lt.s32.totalorder %s1907_s0, %s1907_s0 }
  0x34   :  { %p1914_p9 = por %p1913_p8, %p1912_p7 }
  0x36   :  { %p1915_p10 = pnand %p1914_p9, %p1908_p6 }
  0x38   :  { %1918 = shalt.err (!%p1915_p10)
}
  0x39   :  { %86 = dma.hbm_to_vmem [thread:$0]  %s2118_s7, 4096, %s81_s20, [#allocation9], %s1974_s29, %s1974_s29, %s1975_s30  }
  0x3a   :  { %s1980_s26 = smov [#allocation11]  }
  0x3b   :  { %s94_s27 = sshll.u32 %s1980_s26, 4  ;;  %s95_s27 = int_to_ptr.vmem [resolvable:$true] %s94_s27 }
  0x3c   :  { %s1927_s28 = scalar_lea.vmem %s95_s27, 2048  ;;  %p1932_p12 = scmp.lt.s32.totalorder %s95_s27, %s95_s27 }
  0x3d   :  { %p1928_p11 = scmp.ne.s32.totalorder %s95_s27, %s1927_s28  ;;  %p1933_p13 = scmp.lt.s32.totalorder %s1927_s28, %s1927_s28 }
  0x3f   :  { %p1934_p0 = por %p1933_p13, %p1932_p12 }
  0x41   :  { %p1935_p1 = pnand %p1934_p0, %p1928_p11 }
  0x43   :  { %1938 = shalt.err (!%p1935_p1)
}
  0x44   :  { %100 = dma.hbm_to_vmem [thread:$0]  %s2120_s9, 2048, %s95_s27, [#allocation12], %s1976_s14, %s1976_s14, %s1977_s15  }
  0x45   :  { %1959 = dma.done.wait [#allocation3], 128  }
  0x46   :  { %1960 = vsyncadd [#allocation3], 4294967168 }
  0x47   :  { %1961 = dma.done.wait [#allocation6], 7680  }
  0x48   :  { %1962 = vsyncadd [#allocation6], 4294959616 }
  0x49   :  { %1963 = dma.done.wait [#allocation9], 8192  }
  0x4a   :  { %1964 = vsyncadd [#allocation9], 4294959104 }
  0x4b   :  { %1965 = dma.done.wait [#allocation12], 2048  }
  0x4c   :  { %1966 = vsyncadd [#allocation12], 4294965248  ;;  %v1981_v0 = vmov 0.0   ;;  %vm1982_vm0 = vmmov 0   ;;  %v1983_v1 = vmov 0   ;;  %v1634_v15 = vld [vmem:[#allocation2] sm:$0xff]  }
  0x4d   :  { %1590 = vmatprep.subr.bf16.mxu1 %v1981_v0  ;;  %1598 = vmatprep.mubr.msk.bf16.mxu1 %vm1982_vm0, %v1981_v0  ;;  %v1618_v2 = vld [vmem:[#allocation5 + $0x4c] ss:$12 sps:$4 sm:$0xff]   ;;  %v1620_v3 = vld [vmem:[#allocation5 + $0x50] ss:$12 sps:$4 sm:$0xff]   ;;  %v1621_v4 = vld [vmem:[#allocation5 + $0x48] ss:$12 sps:$4 sm:$0xff]  }
  0x4e   :  { %262 = vmatprep.mubr.bf16.mxu0 %v1983_v1  ;;  %238 = vmatprep.subr.bf16.mxu0 %v1618_v2  ;;  %v1622_v5 = vld [vmem:[#allocation5 + $0x34] ss:$12 sps:$4 sm:$0xff]   ;;  %v1624_v6 = vld [vmem:[#allocation5 + $0x38] ss:$12 sps:$4 sm:$0xff]   ;;  %v1625_v7 = vld [vmem:[#allocation5 + $0x30] ss:$12 sps:$4 sm:$0xff]  }
  0x4f   :  { %1591 = vmatpush3.bf16.msra.mxu1 %v1620_v3  ;;  %239 = vmatpush1.bf16.msra.mxu0 %v1621_v4  ;;  %v1626_v8 = vld [vmem:[#allocation5 + $0x1c] ss:$12 sps:$4 sm:$0xff]   ;;  %v1628_v9 = vld [vmem:[#allocation5 + $0x20] ss:$12 sps:$4 sm:$0xff]   ;;  %v1629_v10 = vld [vmem:[#allocation5 + $0x18] ss:$12 sps:$4 sm:$0xff]  }
  0x50   :  { %1592 = vmatprep.subr.bf16.mxu1 %v1981_v0  ;;  %240 = vmatprep.subr.bf16.mxu0 %v1622_v5  ;;  %v1630_v11 = vld [vmem:[#allocation5 + $0x4] ss:$12 sps:$4 sm:$0xff]   ;;  %v1632_v12 = vld [vmem:[#allocation5 + $0x8] ss:$12 sps:$4 sm:$0xff]   ;;  %v1633_v13 = vld [vmem:[#allocation5] ss:$12 sps:$4 sm:$0xff]  }
  0x51   :  { %v1637_v14 = vld [vmem:[#allocation7 + $0x74] ss:$8 sps:$4 sm:$0xff]   ;;  %vm226_vm1 = vcmask 523264   ;;  %v1635_v16 = vld [vmem:[#allocation7 + $0x70] ss:$8 sps:$4 sm:$0xff]   ;;  %s1984_s16 = smov [#allocation13]  }
  0x52   :  { %v1640_v17 = vld [vmem:[#allocation7 + $0x64] ss:$8 sps:$4 sm:$0xff]   ;;  %v1638_v18 = vld [vmem:[#allocation7 + $0x60] ss:$8 sps:$4 sm:$0xff]   ;;  %v1643_v19 = vld [vmem:[#allocation7 + $0x54] ss:$8 sps:$4 sm:$0xff]  }
  0x53   :  { %1593 = vmatpush3.bf16.msra.mxu1 %v1624_v6  ;;  %241 = vmatpush1.bf16.msra.mxu0 %v1625_v7  ;;  %v1659_v20 = vld [vmem:[#allocation7 + $0x170] ss:$8 sps:$4 sm:$0xff]   ;;  %v1661_v21 = vld [vmem:[#allocation7 + $0x174] ss:$8 sps:$4 sm:$0xff]   ;;  %v1646_v23 = vld [vmem:[#allocation7 + $0x44] ss:$8 sps:$4 sm:$0xff]  }
  0x54   :  { %1594 = vmatprep.subr.bf16.mxu1 %v1981_v0  ;;  %242 = vmatprep.subr.bf16.mxu0 %v1626_v8  ;;  %v1641_v22 = vld [vmem:[#allocation7 + $0x50] ss:$8 sps:$4 sm:$0xff]   ;;  %v1667_v24 = vld [vmem:[#allocation7 + $0x164] ss:$8 sps:$4 sm:$0xff]   ;;  %v1665_v25 = vld [vmem:[#allocation7 + $0x160] ss:$8 sps:$4 sm:$0xff]  }
  0x55   :  { %v1673_v26 = vld [vmem:[#allocation7 + $0x154] ss:$8 sps:$4 sm:$0xff]   ;;  %v1644_v27 = vld [vmem:[#allocation7 + $0x40] ss:$8 sps:$4 sm:$0xff]   ;;  %v1671_v29 = vld [vmem:[#allocation7 + $0x150] ss:$8 sps:$4 sm:$0xff]  }
  0x56   :  { %v1649_v28 = vld [vmem:[#allocation7 + $0x34] ss:$8 sps:$4 sm:$0xff]   ;;  %v1679_v30 = vld [vmem:[#allocation7 + $0x144] ss:$8 sps:$4 sm:$0xff]   ;;  %v1647_v31 = vld [vmem:[#allocation7 + $0x30] ss:$8 sps:$4 sm:$0xff]  }
  0x57   :  { %1595 = vmatpush3.bf16.msra.mxu1 %v1628_v9  ;;  %243 = vmatpush1.bf16.msra.mxu0 %v1629_v10  ;;  %v1652_v32 = vld [vmem:[#allocation7 + $0x24] ss:$8 sps:$4 sm:$0xff]   ;;  %v1677_v33 = vld [vmem:[#allocation7 + $0x140] ss:$8 sps:$4 sm:$0xff]   ;;  %v1685_v34 = vld [vmem:[#allocation7 + $0x134] ss:$8 sps:$4 sm:$0xff]  }
  0x58   :  { %1596 = vmatprep.subr.bf16.mxu1 %v1981_v0  ;;  %244 = vmatprep.subr.bf16.mxu0 %v1630_v11  ;;  %v1650_v35 = vld [vmem:[#allocation7 + $0x20] ss:$8 sps:$4 sm:$0xff]   ;;  %v1655_v36 = vld [vmem:[#allocation7 + $0x14] ss:$8 sps:$4 sm:$0xff]   ;;  %v1683_v37 = vld [vmem:[#allocation7 + $0x130] ss:$8 sps:$4 sm:$0xff]   ;;  %v142_v0 = vlaneseq }
  0x59   :  { %v1691_v38 = vld [vmem:[#allocation7 + $0x124] ss:$8 sps:$4 sm:$0xff]   ;;  %v1653_v39 = vld [vmem:[#allocation7 + $0x10] ss:$8 sps:$4 sm:$0xff]   ;;  %v1689_v41 = vld [vmem:[#allocation7 + $0x120] ss:$8 sps:$4 sm:$0xff]  }
  0x5a   :  { %v1658_v40 = vld [vmem:[#allocation7 + $0x4] ss:$8 sps:$4 sm:$0xff]   ;;  %v1656_v42 = vld [vmem:[#allocation7] ss:$8 sps:$4 sm:$0xff]   ;;  %v1664_v43 = vld [vmem:[#allocation7 + $0xf4] ss:$8 sps:$4 sm:$0xff]  }
  0x5b   :  { %1597 = vmatpush3.bf16.msra.mxu1 %v1632_v12  ;;  %245 = vmatpush1.bf16.msra.mxu0 %v1633_v13  ;;  %v1662_v44 = vld [vmem:[#allocation7 + $0xf0] ss:$8 sps:$4 sm:$0xff]   ;;  %v1670_v45 = vld [vmem:[#allocation7 + $0xe4] ss:$8 sps:$4 sm:$0xff]   ;;  %v1668_v46 = vld [vmem:[#allocation7 + $0xe0] ss:$8 sps:$4 sm:$0xff]  }
  0x5c   :  { %623 = vmatprep.subr.bf16.mxu0 %v1637_v14  ;;  %666 = vmatprep.subr.bf16.mxu1 %v1661_v21  ;;  %v1676_v47 = vld [vmem:[#allocation7 + $0xd4] ss:$8 sps:$4 sm:$0xff]   ;;  %v1674_v48 = vld [vmem:[#allocation7 + $0xd0] ss:$8 sps:$4 sm:$0xff]   ;;  %v1682_v49 = vld [vmem:[#allocation7 + $0xc4] ss:$8 sps:$4 sm:$0xff]  }
  0x5d   :  { %v1680_v50 = vld [vmem:[#allocation7 + $0xc0] ss:$8 sps:$4 sm:$0xff]   ;;  %v1688_v51 = vld [vmem:[#allocation7 + $0xb4] ss:$8 sps:$4 sm:$0xff]   ;;  %v1686_v52 = vld [vmem:[#allocation7 + $0xb0] ss:$8 sps:$4 sm:$0xff]  }
  0x5e   :  { %1599 = vmatmul.mubr.msk.bf16.vlgmr.msra.gmra.mxu1 %vm226_vm1, %v1634_v15  ;;  %1432 = vmatmul.mubr.msk.bf16.vlgmr.msra.gmra.mxu0 %vm226_vm1, %v1634_v15  ;;  %v1694_v53 = vld [vmem:[#allocation7 + $0xa4] ss:$8 sps:$4 sm:$0xff]   ;;  %v1697_v54 = vld [vmem:[#allocation7 + $0x114] ss:$8 sps:$4 sm:$0xff]   ;;  %v1692_v55 = vld [vmem:[#allocation7 + $0xa0] ss:$8 sps:$4 sm:$0xff]  }
  0x5f   :  { %698 = vmatprep.mubr.bf16.mxu1 %v1983_v1  ;;  %624 = vmatpush1.bf16.msra.mxu0 %v1635_v16  ;;  %v1695_v56 = vld [vmem:[#allocation7 + $0x110] ss:$8 sps:$4 sm:$0xff]   ;;  %v1700_v57 = vld [vmem:[#allocation7 + $0x94] ss:$8 sps:$4 sm:$0xff]   ;;  %v1703_v58 = vld [vmem:[#allocation7 + $0x104] ss:$8 sps:$4 sm:$0xff]  }
  0x60   :  { %625 = vmatprep.subr.bf16.mxu0 %v1640_v17  ;;  %667 = vmatpush1.bf16.msra.mxu1 %v1659_v20  ;;  %v1698_v59 = vld [vmem:[#allocation7 + $0x90] ss:$8 sps:$4 sm:$0xff]   ;;  %v1701_v60 = vld [vmem:[#allocation7 + $0x100] ss:$8 sps:$4 sm:$0xff]   ;;  %v1706_v61 = vld [vmem:[#allocation7 + $0x84] ss:$8 sps:$4 sm:$0xff]  }
  0x61   :  { %668 = vmatprep.subr.bf16.mxu1 %v1667_v24  ;;  %v1704_v62 = vld [vmem:[#allocation7 + $0x80] ss:$8 sps:$4 sm:$0xff]   ;;  %v1709_v63 = vld [vmem:[#allocation8 + $0x74] ss:$8 sps:$4 sm:$0xff]   ;;  %v143_v1 = vshrl.u32 %v142_v0, 7  ;;  %s1404_s17 = sshll.u32 %s1984_s16, 4  ;;  %s1405_s17 = int_to_ptr.vmem [resolvable:$true] %s1404_s17 }
  0x62   :  { %v140_v3 = vld [vmem:[%s2113_s2] sm:$0x7]  ;;  %v1757_v0 = vld [vmem:[#allocation10 + $0x74] ss:$8 sps:$4 sm:$0xff]   ;;  %s1939_s18 = scalar_lea.vmem %s1405_s17, 256  ;;  %p1944_p3 = scmp.lt.s32.totalorder %s1405_s17, %s1405_s17 }
  0x63   :  { %626 = vmatpush1.bf16.msra.mxu0 %v1638_v18  ;;  %v152_v2 = vsub.s32 2, %v143_v1  ;;  %v2081_v5 = vsub.s32 1, %v143_v1  ;;  %v2083_v6 = vsub.s32 0, %v143_v1  ;;  %v1760_v1 = vld [vmem:[#allocation10 + $0x64] ss:$8 sps:$4 sm:$0xff]   ;;  %p1940_p2 = scmp.ne.s32.totalorder %s1405_s17, %s1939_s18  ;;  %p1945_p4 = scmp.lt.s32.totalorder %s1939_s18, %s1939_s18 }
  0x64   :  { %627 = vmatprep.subr.bf16.mxu0 %v1643_v19  ;;  %669 = vmatpush1.bf16.msra.mxu1 %v1665_v25  ;;  %v1707_v25 = vld [vmem:[#allocation8 + $0x70] ss:$8 sps:$4 sm:$0xff]  }
  0x65   :  { %670 = vmatprep.subr.bf16.mxu1 %v1673_v26  ;;  %v153_v4 = vrot.slane %v140_v3, %v152_v2  ;;  %v149_v11 = vrot.slane %v140_v3, %v2081_v5  ;;  %v145_v12 = vrot.slane %v140_v3, %v2083_v6  ;;  %v1758_v2 = vld [vmem:[#allocation10 + $0x60] ss:$8 sps:$4 sm:$0xff]   ;;  %v1763_v3 = vld [vmem:[#allocation10 + $0x54] ss:$8 sps:$4 sm:$0xff]   ;;  %p1946_p5 = por %p1945_p4, %p1944_p3 }
  0x67   :  { %628 = vmatpush1.bf16.msra.mxu0 %v1641_v22  ;;  %p1947_p6 = pnand %p1946_p5, %p1940_p2 }
  0x68   :  { %629 = vmatprep.subr.bf16.mxu0 %v1646_v23  ;;  %671 = vmatpush1.bf16.msra.mxu1 %v1671_v29 }
  0x69   :  { %672 = vmatprep.subr.bf16.mxu1 %v1679_v30 }
  0x6b   :  { %630 = vmatpush1.bf16.msra.mxu0 %v1644_v27 }
  0x6c   :  { %631 = vmatprep.subr.bf16.mxu0 %v1649_v28  ;;  %673 = vmatpush1.bf16.msra.mxu1 %v1677_v33  ;;  %v1712_v28 = vld [vmem:[#allocation8 + $0x64] ss:$8 sps:$4 sm:$0xff]   ;;  %v1710_v33 = vld [vmem:[#allocation8 + $0x60] ss:$8 sps:$4 sm:$0xff]  }
  0x6d   :  { %674 = vmatprep.subr.bf16.mxu1 %v1685_v34 }
  0x6f   :  { %632 = vmatpush1.bf16.msra.mxu0 %v1647_v31 }
  0x70   :  { %633 = vmatprep.subr.bf16.mxu0 %v1652_v32  ;;  %675 = vmatpush1.bf16.msra.mxu1 %v1683_v37  ;;  %v1718_v37 = vld [vmem:[#allocation8 + $0x44] ss:$8 sps:$4 sm:$0xff]  }
  0x71   :  { %676 = vmatprep.subr.bf16.mxu1 %v1691_v38  ;;  %v1716_v38 = vld [vmem:[#allocation8 + $0x40] ss:$8 sps:$4 sm:$0xff]  }
  0x73   :  { %634 = vmatpush1.bf16.msra.mxu0 %v1650_v35  ;;  %v1715_v35 = vld [vmem:[#allocation8 + $0x54] ss:$8 sps:$4 sm:$0xff]  }
  0x74   :  { %635 = vmatprep.subr.bf16.mxu0 %v1655_v36  ;;  %677 = vmatpush1.bf16.msra.mxu1 %v1689_v41  ;;  %v1713_v36 = vld [vmem:[#allocation8 + $0x50] ss:$8 sps:$4 sm:$0xff]   ;;  %v1724_v41 = vld [vmem:[#allocation8 + $0x24] ss:$8 sps:$4 sm:$0xff]  }
  0x75   :  { %678 = vmatprep.subr.bf16.mxu1 %v1697_v54  ;;  %v1740_v54 = vld [vmem:[#allocation8 + $0xc0] ss:$8 sps:$4 sm:$0xff]  }
  0x77   :  { %636 = vmatpush1.bf16.msra.mxu0 %v1653_v39  ;;  %v1721_v39 = vld [vmem:[#allocation8 + $0x34] ss:$8 sps:$4 sm:$0xff]  }
  0x78   :  { %637 = vmatprep.subr.bf16.mxu0 %v1658_v40  ;;  %679 = vmatpush1.bf16.msra.mxu1 %v1695_v56  ;;  %v1719_v40 = vld [vmem:[#allocation8 + $0x30] ss:$8 sps:$4 sm:$0xff]  }
  0x79   :  { %680 = vmatprep.subr.bf16.mxu1 %v1703_v58  ;;  %v1743_v56 = vld [vmem:[#allocation8 + $0xb0] ss:$8 sps:$4 sm:$0xff]   ;;  %v1746_v58 = vld [vmem:[#allocation8 + $0xa0] ss:$8 sps:$4 sm:$0xff]  }
  0x7b   :  { %638 = vmatpush1.bf16.msra.mxu0 %v1656_v42  ;;  %v1722_v42 = vld [vmem:[#allocation8 + $0x20] ss:$8 sps:$4 sm:$0xff]  }
  0x7c   :  { %639 = vmatprep.subr.bf16.mxu0 %v1664_v43  ;;  %681 = vmatpush1.bf16.msra.mxu1 %v1701_v60  ;;  %v1727_v43 = vld [vmem:[#allocation8 + $0x14] ss:$8 sps:$4 sm:$0xff]   ;;  %v1749_v60 = vld [vmem:[#allocation8 + $0x90] ss:$8 sps:$4 sm:$0xff]  }
  0x7d   :  { %919 = vmatprep.subr.bf16.mxu1 %v1709_v63  ;;  %v1755_v63 = vld [vmem:[#allocation10 + $0x70] ss:$8 sps:$4 sm:$0xff]  }
  0x7f   :  { %640 = vmatpush2.bf16.msra.mxu0 %v1662_v44  ;;  %v1725_v44 = vld [vmem:[#allocation8 + $0x10] ss:$8 sps:$4 sm:$0xff]  }
  0x80   :  { %641 = vmatprep.subr.bf16.mxu0 %v1670_v45  ;;  %v1730_v45 = vld [vmem:[#allocation8 + $0x4] ss:$8 sps:$4 sm:$0xff]  }
  0x83   :  { %642 = vmatpush2.bf16.msra.mxu0 %v1668_v46  ;;  %v1728_v46 = vld [vmem:[#allocation8] ss:$8 sps:$4 sm:$0xff]  }
  0x84   :  { %643 = vmatprep.subr.bf16.mxu0 %v1676_v47  ;;  %v1733_v47 = vld [vmem:[#allocation8 + $0xf4] ss:$8 sps:$4 sm:$0xff]  }
  0x87   :  { %644 = vmatpush2.bf16.msra.mxu0 %v1674_v48  ;;  %v1731_v48 = vld [vmem:[#allocation8 + $0xf0] ss:$8 sps:$4 sm:$0xff]  }
  0x88   :  { %645 = vmatprep.subr.bf16.mxu0 %v1682_v49  ;;  %v1736_v49 = vld [vmem:[#allocation8 + $0xe4] ss:$8 sps:$4 sm:$0xff]  }
  0x8b   :  { %646 = vmatpush2.bf16.msra.mxu0 %v1680_v50  ;;  %v1734_v50 = vld [vmem:[#allocation8 + $0xe0] ss:$8 sps:$4 sm:$0xff]  }
  0x8c   :  { %647 = vmatprep.subr.bf16.mxu0 %v1688_v51  ;;  %v1739_v51 = vld [vmem:[#allocation8 + $0xd4] ss:$8 sps:$4 sm:$0xff]  }
  0x8f   :  { %648 = vmatpush2.bf16.msra.mxu0 %v1686_v52  ;;  %v1737_v52 = vld [vmem:[#allocation8 + $0xd0] ss:$8 sps:$4 sm:$0xff]  }
  0x90   :  { %649 = vmatprep.subr.bf16.mxu0 %v1694_v53  ;;  %v1742_v53 = vld [vmem:[#allocation8 + $0xc4] ss:$8 sps:$4 sm:$0xff]  }
  0x93   :  { %650 = vmatpush2.bf16.msra.mxu0 %v1692_v55  ;;  %v1745_v55 = vld [vmem:[#allocation8 + $0xb4] ss:$8 sps:$4 sm:$0xff]  }
  0x94   :  { %651 = vmatprep.subr.bf16.mxu0 %v1700_v57  ;;  %v1748_v57 = vld [vmem:[#allocation8 + $0xa4] ss:$8 sps:$4 sm:$0xff]  }
  0x97   :  { %652 = vmatpush2.bf16.msra.mxu0 %v1698_v59  ;;  %v1751_v59 = vld [vmem:[#allocation8 + $0x94] ss:$8 sps:$4 sm:$0xff]  }
  0x98   :  { %653 = vmatprep.subr.bf16.mxu0 %v1706_v61  ;;  %v1754_v61 = vld [vmem:[#allocation8 + $0x84] ss:$8 sps:$4 sm:$0xff]  }
  0x9b   :  { %654 = vmatpush2.bf16.msra.mxu0 %v1704_v62  ;;  %v1752_v62 = vld [vmem:[#allocation8 + $0x80] ss:$8 sps:$4 sm:$0xff]  }
  0x9c   :  { %1172 = vmatprep.subr.bf16.mxu0 %v1757_v0  ;;  %v1809_v0 = vld [vmem:[#allocation11 + $0x60] sm:$0xff]  }
 0x11e   :  { %v307_v7 = vpop.f32.mrf.mxu1  ;;  %v264_v9 = vpop.f32.mrf.mxu0 }
 0x11f   :  { %v308_v8 = vadd.f32 %v307_v7, %v153_v4  ;;  %v265_v21 = vadd.f32 %v264_v9, %v145_v12  ;;  %v1766_v7 = vld [vmem:[#allocation10 + $0x44] ss:$8 sps:$4 sm:$0xff]   ;;  %v1769_v9 = vld [vmem:[#allocation10 + $0x34] ss:$8 sps:$4 sm:$0xff]  }
 0x120   :  { %v1600_v10 = vpop.f32.mrf.mxu1  ;;  %v266_v13 = vpop.f32.mrf.mxu0 }
 0x121   :  { %v316_v15 = vmax.f32 %v308_v8, 0.0  ;;  %v267_v18 = vadd.f32 %v266_v13, %v149_v11  ;;  %v314_v31 = vmax.f32 %v265_v21, 0.0  ;;  %v1764_v8 = vld [vmem:[#allocation10 + $0x40] ss:$8 sps:$4 sm:$0xff]   ;;  %v1767_v10 = vld [vmem:[#allocation10 + $0x30] ss:$8 sps:$4 sm:$0xff]  }
 0x122   :  { %v310_v14 = vpop.f32.mrf.mxu1  ;;  %v268_v17 = vpop.f32.mrf.mxu0  ;;  %v1775_v13 = vld [vmem:[#allocation10 + $0x14] ss:$8 sps:$4 sm:$0xff]  }
 0x123   :  { %v311_v16 = vadd.f32 %v310_v14, %v153_v4  ;;  %v269_v19 = vadd.f32 %v268_v17, %v145_v12  ;;  %v315_v29 = vmax.f32 %v267_v18, 0.0  ;;  %v1761_v4 = vld [vmem:[#allocation10 + $0x50] ss:$8 sps:$4 sm:$0xff]   ;;  %v1770_v12 = vld [vmem:[#allocation10 + $0x20] ss:$8 sps:$4 sm:$0xff]  }
 0x124   :  { %v1601_v20 = vpop.f32.mrf.mxu1  ;;  %v270_v23 = vpop.f32.mrf.mxu0  ;;  %v1773_v14 = vld [vmem:[#allocation10 + $0x10] ss:$8 sps:$4 sm:$0xff]   ;;  %v1781_v17 = vld [vmem:[#allocation10 + $0xf4] ss:$8 sps:$4 sm:$0xff]  }
 0x125   :  { %v319_v22 = vmax.f32 %v311_v16, 0.0  ;;  %v271_v24 = vadd.f32 %v270_v23, %v149_v11  ;;  %v317_v27 = vmax.f32 %v269_v19, 0.0  ;;  %v1772_v11 = vld [vmem:[#allocation10 + $0x24] ss:$8 sps:$4 sm:$0xff]   ;;  %v1776_v16 = vld [vmem:[#allocation10] ss:$8 sps:$4 sm:$0xff]  }
 0x126   :  { %v1779_v18 = vld [vmem:[#allocation10 + $0xf0] ss:$8 sps:$4 sm:$0xff]   ;;  %v1784_v19 = vld [vmem:[#allocation10 + $0xe4] ss:$8 sps:$4 sm:$0xff]   ;;  %v1782_v20 = vld [vmem:[#allocation10 + $0xe0] ss:$8 sps:$4 sm:$0xff]  }
 0x127   :  { %v322_v26 = vpack.c.bf16 %v319_v22, %v316_v15  ;;  %v318_v30 = vmax.f32 %v271_v24, 0.0  ;;  %v320_v34 = vpack.c.bf16 %v317_v27, %v314_v31  ;;  %v1778_v15 = vld [vmem:[#allocation10 + $0x4] ss:$8 sps:$4 sm:$0xff]   ;;  %v1787_v21 = vld [vmem:[#allocation10 + $0xd4] ss:$8 sps:$4 sm:$0xff]  }
 0x128   :  { %v1785_v22 = vld [vmem:[#allocation10 + $0xd0] ss:$8 sps:$4 sm:$0xff]   ;;  %v1790_v23 = vld [vmem:[#allocation10 + $0xc4] ss:$8 sps:$4 sm:$0xff]   ;;  %v1788_v24 = vld [vmem:[#allocation10 + $0xc0] ss:$8 sps:$4 sm:$0xff]  }
 0x129   :  { %699 = vmatmul.mubr.bf16.vlgmr.msra.gmra.mxu1 %v322_v26  ;;  %v321_v32 = vpack.c.bf16 %v318_v30, %v315_v29  ;;  %v1791_v26 = vld [vmem:[#allocation10 + $0xb0] ss:$8 sps:$4 sm:$0xff]  }
 0x12a   :  { %920 = vmatpush1.bf16.msra.mxu1 %v1707_v25  ;;  %v1793_v25 = vld [vmem:[#allocation10 + $0xb4] ss:$8 sps:$4 sm:$0xff]  }
 0x12b   :  { %921 = vmatprep.subr.bf16.mxu1 %v1712_v28  ;;  %655 = vmatprep.mubr.bf16.mxu0 %v321_v32  ;;  %v371_v28 = vld [vmem:[%s2115_s4] sm:$0x3] }
 0x12c   :  { %656 = vmatmul.mubr.bf16.vlgmr.msra.gmra.mxu0 %v320_v34  ;;  %v380_v29 = vrot.slane %v371_v28, %v2081_v5  ;;  %v376_v31 = vrot.slane %v371_v28, %v2083_v6  ;;  %v1818_v28 = vld [vmem:[#allocation11] sm:$0xff]  }
 0x12d   :  { %1173 = vmatpush1.bf16.msra.mxu0 %v1755_v63  ;;  %v1808_v63 = vld [vmem:[#allocation11 + $0x28] sm:$0xff]  }
 0x12e   :  { %922 = vmatpush1.bf16.msra.mxu1 %v1710_v33  ;;  %1174 = vmatprep.subr.bf16.mxu0 %v1760_v1  ;;  %v1810_v1 = vld [vmem:[#allocation11 + $0x20] sm:$0xff]  }
 0x12f   :  { %923 = vmatprep.subr.bf16.mxu1 %v1715_v35 }
 0x131   :  { %1175 = vmatpush1.bf16.msra.mxu0 %v1758_v2  ;;  %v1811_v2 = vld [vmem:[#allocation11 + $0x58] sm:$0xff]  }
 0x132   :  { %924 = vmatpush1.bf16.msra.mxu1 %v1713_v36  ;;  %1176 = vmatprep.subr.bf16.mxu0 %v1763_v3  ;;  %v1812_v3 = vld [vmem:[#allocation11 + $0x18] sm:$0xff]  }
 0x133   :  { %925 = vmatprep.subr.bf16.mxu1 %v1718_v37 }
 0x135   :  { %1177 = vmatpush1.bf16.msra.mxu0 %v1761_v4  ;;  %v747_v4 = vld [vmem:[%s2117_s6] sm:$0x3] }
 0x136   :  { %926 = vmatpush1.bf16.msra.mxu1 %v1716_v38  ;;  %1178 = vmatprep.subr.bf16.mxu0 %v1766_v7 }
 0x137   :  { %927 = vmatprep.subr.bf16.mxu1 %v1721_v39 }
 0x139   :  { %1179 = vmatpush1.bf16.msra.mxu0 %v1764_v8  ;;  %v756_v8 = vrot.slane %v747_v4, %v2081_v5 }
 0x13a   :  { %928 = vmatpush1.bf16.msra.mxu1 %v1719_v40  ;;  %1180 = vmatprep.subr.bf16.mxu0 %v1769_v9  ;;  %v752_v9 = vrot.slane %v747_v4, %v2083_v6 }
 0x13b   :  { %929 = vmatprep.subr.bf16.mxu1 %v1724_v41 }
 0x13d   :  { %1181 = vmatpush1.bf16.msra.mxu0 %v1767_v10 }
 0x13e   :  { %930 = vmatpush1.bf16.msra.mxu1 %v1722_v42  ;;  %1182 = vmatprep.subr.bf16.mxu0 %v1772_v11 }
 0x13f   :  { %931 = vmatprep.subr.bf16.mxu1 %v1727_v43 }
 0x141   :  { %1183 = vmatpush1.bf16.msra.mxu0 %v1770_v12 }
 0x142   :  { %932 = vmatpush1.bf16.msra.mxu1 %v1725_v44  ;;  %1184 = vmatprep.subr.bf16.mxu0 %v1775_v13 }
 0x143   :  { %933 = vmatprep.subr.bf16.mxu1 %v1730_v45 }
 0x145   :  { %1185 = vmatpush1.bf16.msra.mxu0 %v1773_v14 }
 0x146   :  { %934 = vmatpush1.bf16.msra.mxu1 %v1728_v46  ;;  %1186 = vmatprep.subr.bf16.mxu0 %v1778_v15 }
 0x147   :  { %935 = vmatprep.subr.bf16.mxu1 %v1733_v47 }
 0x149   :  { %1187 = vmatpush1.bf16.msra.mxu0 %v1776_v16 }
 0x14a   :  { %936 = vmatpush2.bf16.msra.mxu1 %v1731_v48  ;;  %1188 = vmatprep.subr.bf16.mxu0 %v1781_v17 }
 0x14b   :  { %937 = vmatprep.subr.bf16.mxu1 %v1736_v49 }
 0x14d   :  { %1189 = vmatpush2.bf16.msra.mxu0 %v1779_v18 }
 0x14e   :  { %938 = vmatpush2.bf16.msra.mxu1 %v1734_v50  ;;  %1190 = vmatprep.subr.bf16.mxu0 %v1784_v19 }
 0x14f   :  { %939 = vmatprep.subr.bf16.mxu1 %v1739_v51 }
 0x151   :  { %1191 = vmatpush2.bf16.msra.mxu0 %v1782_v20 }
 0x152   :  { %940 = vmatpush2.bf16.msra.mxu1 %v1737_v52  ;;  %1192 = vmatprep.subr.bf16.mxu0 %v1787_v21  ;;  %v1796_v52 = vld [vmem:[#allocation10 + $0xa4] ss:$8 sps:$4 sm:$0xff]  }
 0x153   :  { %941 = vmatprep.subr.bf16.mxu1 %v1742_v53  ;;  %v1794_v53 = vld [vmem:[#allocation10 + $0xa0] ss:$8 sps:$4 sm:$0xff]  }
 0x155   :  { %1193 = vmatpush2.bf16.msra.mxu0 %v1785_v22 }
 0x156   :  { %942 = vmatpush2.bf16.msra.mxu1 %v1740_v54  ;;  %1194 = vmatprep.subr.bf16.mxu0 %v1790_v23  ;;  %v1799_v54 = vld [vmem:[#allocation10 + $0x94] ss:$8 sps:$4 sm:$0xff]  }
 0x157   :  { %943 = vmatprep.subr.bf16.mxu1 %v1745_v55  ;;  %v1797_v55 = vld [vmem:[#allocation10 + $0x90] ss:$8 sps:$4 sm:$0xff]  }
 0x158   :  { %v1813_v23 = vld [vmem:[#allocation11 + $0x50] sm:$0xff]  }
 0x159   :  { %1195 = vmatpush2.bf16.msra.mxu0 %v1788_v24  ;;  %v1814_v24 = vld [vmem:[#allocation11 + $0x10] sm:$0xff]  }
 0x15a   :  { %944 = vmatpush2.bf16.msra.mxu1 %v1743_v56  ;;  %1196 = vmatprep.subr.bf16.mxu0 %v1793_v25  ;;  %v1802_v56 = vld [vmem:[#allocation10 + $0x84] ss:$8 sps:$4 sm:$0xff]  }
 0x15b   :  { %945 = vmatprep.subr.bf16.mxu1 %v1748_v57  ;;  %v1800_v57 = vld [vmem:[#allocation10 + $0x80] ss:$8 sps:$4 sm:$0xff]  }
 0x15c   :  { %v1815_v25 = vld [vmem:[#allocation11 + $0x48] sm:$0xff]  }
 0x15d   :  { %1197 = vmatpush2.bf16.msra.mxu0 %v1791_v26  ;;  %v1816_v26 = vld [vmem:[#allocation11 + $0x8] sm:$0xff]  }
 0x15e   :  { %946 = vmatpush2.bf16.msra.mxu1 %v1746_v58  ;;  %1198 = vmatprep.subr.bf16.mxu0 %v1796_v52  ;;  %v1803_v58 = vld [vmem:[#allocation11 + $0x78] sm:$0xff]  }
 0x15f   :  { %947 = vmatprep.subr.bf16.mxu1 %v1751_v59  ;;  %v1804_v59 = vld [vmem:[#allocation11 + $0x38] sm:$0xff]  }
 0x161   :  { %1199 = vmatpush2.bf16.msra.mxu0 %v1794_v53 }
 0x162   :  { %948 = vmatpush2.bf16.msra.mxu1 %v1749_v60  ;;  %1200 = vmatprep.subr.bf16.mxu0 %v1799_v54  ;;  %v1805_v60 = vld [vmem:[#allocation11 + $0x70] sm:$0xff]  }
 0x163   :  { %949 = vmatprep.subr.bf16.mxu1 %v1754_v61  ;;  %v1806_v61 = vld [vmem:[#allocation11 + $0x30] sm:$0xff]  }
 0x165   :  { %1201 = vmatpush2.bf16.msra.mxu0 %v1797_v55 }
 0x166   :  { %950 = vmatpush2.bf16.msra.mxu1 %v1752_v62  ;;  %1202 = vmatprep.subr.bf16.mxu0 %v1802_v56  ;;  %v1807_v62 = vld [vmem:[#allocation11 + $0x68] sm:$0xff]  }
 0x167   :  { %1568 = vmatprep.subr.bf16.mxu1 %v1803_v58 }
 0x169   :  { %1203 = vmatpush2.bf16.msra.mxu0 %v1800_v57 }
 0x1e9   :  { %v700_v27 = vpop.f32.mrf.mxu1 }
 0x1eb   :  { %v702_v30 = vpop.f32.mrf.mxu1 }
 0x1ec   :  { %v657_v32 = vpop.f32.mrf.mxu0 }
 0x1ed   :  { %v658_v35 = vadd.f32 %v657_v32, %v376_v31  ;;  %v704_v36 = vpop.f32.mrf.mxu1 }
 0x1ee   :  { %v659_v33 = vpop.f32.mrf.mxu0 }
 0x1ef   :  { %v660_v34 = vadd.f32 %v659_v33, %v380_v29  ;;  %v701_v43 = vadd.f32 %v700_v27, %v658_v35  ;;  %v706_v44 = vpop.f32.mrf.mxu1  ;;  %v1817_v27 = vld [vmem:[#allocation11 + $0x40] sm:$0xff]  }
 0x1f0   :  { %v661_v37 = vpop.f32.mrf.mxu0 }
 0x1f1   :  { %v662_v38 = vadd.f32 %v661_v37, %v376_v31  ;;  %v703_v40 = vadd.f32 %v702_v30, %v660_v34  ;;  %v709_v49 = vmax.f32 %v701_v43, 0.0 }
 0x1f2   :  { %v663_v39 = vpop.f32.mrf.mxu0 }
 0x1f3   :  { %v705_v41 = vadd.f32 %v704_v36, %v662_v38  ;;  %v664_v42 = vadd.f32 %v663_v39, %v380_v29  ;;  %v710_v47 = vmax.f32 %v703_v40, 0.0  ;;  %v1000_v29 = vld [vmem:[%s2119_s8] sm:$0x3] }
 0x1f4   :  { %v1009_v31 = vrot.slane %v1000_v29, %v2081_v5  ;;  %v1005_v32 = vrot.slane %v1000_v29, %v2083_v6  ;;  %v1546_v5 = vld [vmem:[%s2121_s10] ss:$0 sm:$0xff] }
 0x1f5   :  { %v707_v45 = vadd.f32 %v706_v44, %v664_v42  ;;  %v711_v46 = vmax.f32 %v705_v41, 0.0 }
 0x1f7   :  { %v712_v48 = vmax.f32 %v707_v45, 0.0  ;;  %v713_v51 = vpack.c.bf16 %v711_v46, %v709_v49 }
 0x1f9   :  { %v714_v50 = vpack.c.bf16 %v712_v48, %v710_v47 }
 0x1fb   :  { %951 = vmatprep.mubr.bf16.mxu1 %v714_v50 }
 0x1fc   :  { %952 = vmatmul.mubr.bf16.vlgmr.msra.gmra.mxu1 %v713_v51 }
 0x1fd   :  { %1569 = vmatpush3.bf16.msra.mxu1 %v1804_v59 }
 0x1fe   :  { %1570 = vmatprep.subr.bf16.mxu1 %v1805_v60 }
 0x201   :  { %1571 = vmatpush3.bf16.msra.mxu1 %v1806_v61 }
 0x202   :  { %1572 = vmatprep.subr.bf16.mxu1 %v1807_v62 }
 0x205   :  { %1573 = vmatpush3.bf16.msra.mxu1 %v1808_v63 }
 0x206   :  { %1574 = vmatprep.subr.bf16.mxu1 %v1809_v0 }
 0x209   :  { %1575 = vmatpush3.bf16.msra.mxu1 %v1810_v1 }
 0x20a   :  { %1576 = vmatprep.subr.bf16.mxu1 %v1811_v2 }
 0x20d   :  { %1577 = vmatpush3.bf16.msra.mxu1 %v1812_v3 }
 0x20e   :  { %1578 = vmatprep.subr.bf16.mxu1 %v1813_v23 }
 0x211   :  { %1579 = vmatpush3.bf16.msra.mxu1 %v1814_v24 }
 0x212   :  { %1580 = vmatprep.subr.bf16.mxu1 %v1815_v25 }
 0x215   :  { %1581 = vmatpush3.bf16.msra.mxu1 %v1816_v26 }
 0x216   :  { %1582 = vmatprep.subr.bf16.mxu1 %v1817_v27 }
 0x219   :  { %1583 = vmatpush3.bf16.msra.mxu1 %v1818_v28 }
 0x2bc   :  { %v953_v7 = vpop.f32.mrf.mxu1 }
 0x2bd   :  { %v954_v14 = vadd.f32 %v953_v7, %v752_v9 }
 0x2be   :  { %v955_v10 = vpop.f32.mrf.mxu1 }
 0x2bf   :  { %v956_v12 = vadd.f32 %v955_v10, %v756_v8  ;;  %v962_v20 = vmax.f32 %v954_v14, 0.0 }
 0x2c0   :  { %v957_v11 = vpop.f32.mrf.mxu1 }
 0x2c1   :  { %v958_v13 = vadd.f32 %v957_v11, %v752_v9  ;;  %v963_v18 = vmax.f32 %v956_v12, 0.0 }
 0x2c2   :  { %v959_v15 = vpop.f32.mrf.mxu1 }
 0x2c3   :  { %v960_v16 = vadd.f32 %v959_v15, %v756_v8  ;;  %v964_v17 = vmax.f32 %v958_v13, 0.0 }
 0x2c5   :  { %v965_v19 = vmax.f32 %v960_v16, 0.0  ;;  %v966_v22 = vpack.c.bf16 %v964_v17, %v962_v20 }
 0x2c7   :  { %v967_v21 = vpack.c.bf16 %v965_v19, %v963_v18 }
 0x2c9   :  { %1204 = vmatprep.mubr.bf16.mxu0 %v967_v21 }
 0x2ca   :  { %1205 = vmatmul.mubr.bf16.vlgmr.msra.gmra.mxu0 %v966_v22 }
 0x38a   :  { %v1206_v30 = vpop.f32.mrf.mxu0 }
 0x38b   :  { %v1207_v37 = vadd.f32 %v1206_v30, %v1005_v32 }
 0x38c   :  { %v1208_v33 = vpop.f32.mrf.mxu0 }
 0x38d   :  { %v1209_v35 = vadd.f32 %v1208_v33, %v1009_v31  ;;  %v1215_v43 = vmax.f32 %v1207_v37, 0.0 }
 0x38e   :  { %v1210_v34 = vpop.f32.mrf.mxu0 }
 0x38f   :  { %v1211_v36 = vadd.f32 %v1210_v34, %v1005_v32  ;;  %v1216_v41 = vmax.f32 %v1209_v35, 0.0 }
 0x390   :  { %v1212_v38 = vpop.f32.mrf.mxu0 }
 0x391   :  { %v1213_v39 = vadd.f32 %v1212_v38, %v1009_v31  ;;  %v1217_v40 = vmax.f32 %v1211_v36, 0.0 }
 0x393   :  { %v1218_v42 = vmax.f32 %v1213_v39, 0.0  ;;  %v1219_v45 = vpack.c.bf16 %v1217_v40, %v1215_v43 }
 0x395   :  { %v1220_v44 = vpack.c.bf16 %v1218_v42, %v1216_v41 }
 0x397   :  { %1388 = vmatprep.mubr.bf16.mxu1 %v1220_v44 }
 0x398   :  { %1389 = vmatmul.mubr.bf16.vlgmr.msra.gmra.mxu1 %v1219_v45 }
 0x458   :  { %v1584_v46 = vpop.f32.mrf.mxu1 }
 0x45a   :  { %v1585_v6 = vpop.f32.mrf.mxu1 }
 0x45b   :  { %v1586_v47 = vadd.f32 %v1585_v6, %v1584_v46 }
 0x45c   :  { %v1587_v48 = vpop.f32.mrf.mxu1 }
 0x45d   :  { %v1391_v49 = vadd.f32 %v1586_v47, %v1546_v5 }
 0x45e   :  { %v1588_v50 = vpop.f32.mrf.mxu1 }
 0x45f   :  { %1397 = vst [vmem:[#allocation13] sm:$0xff] %v1391_v49  ;;  %v1589_v51 = vadd.f32 %v1588_v50, %v1587_v48 }
 0x461   :  { %v1394_v52 = vadd.f32 %v1589_v51, %v1546_v5 }
 0x463   :  { %1398 = vst [vmem:[#allocation13 + $0x8] sm:$0xff] %v1394_v52 }
 0x464   :  { %1950 = shalt.err (!%p1947_p6)
}
 0x465   :  { %1410 = dma.vmem_to_hbm [thread:$0]  %s1405_s17, 256, %s2122_s11, [#allocation4], %s1974_s29, %s1974_s29, %s1975_s30  }
 0x466   :  { %1967 = dma.done.wait [#allocation4], 256  }
 0x467   :  { %1968 = vsyncadd [#allocation4], 4294967040 }
 0x468   :  { %1414 = vsyncpa [#allocation3], 1 }
 0x469   :  { %1415 = vsyncpa [#allocation6], 1 }
 0x46a   :  { %1416 = vsyncpa [#allocation9], 1 }
 0x46b   :  { %1417 = vsyncpa [#allocation12], 1 }
 0x46c   :  { %1418 = vsyncpa [#allocation4], 1 }

</bundles_post_ra>
